<compile_context>
chip_gen: v7x
topology: tpu7x:2x2x1
jax: 0.10.0
libtpu: 0.0.40
codegen_flags: <defaults>
</compile_context>

<pallas_src>
import functools

import jax
import jax.numpy as jnp
from jax.experimental import pallas as pl
from jax.experimental.pallas import tpu as pltpu


def _clam_sb_kernel(h_ref, w1_ref, b1_ref, wab_ref, bab_ref, wc_ref, bc_ref,
                    m_out_ref, a_out_ref, m_sc, l_sc, acc_sc, *, n_valid):
    i = pl.program_id(0)
    tile_n = h_ref.shape[0]
    d2 = wab_ref.shape[1] // 2

    # ---- init online-softmax state on the first tile -----------------------
    @pl.when(i == 0)
    def _init():
        m_sc[...] = jnp.full_like(m_sc, -jnp.inf)
        l_sc[...] = jnp.zeros_like(l_sc)
        acc_sc[...] = jnp.zeros_like(acc_sc)

    # ---- fc: Linear(L, D1) + ReLU  (bf16 MXU, f32 accumulate) ---------------
    hf = jnp.dot(h_ref[...], w1_ref[...], preferred_element_type=jnp.float32)
    hf = jnp.maximum(hf + b1_ref[...], 0.0)                      # [T, D1] f32

    # ---- Attn_Net_Gated: fused [wa | wb] matmul (full 128-lane output) ------
    ab = jnp.dot(hf.astype(jnp.bfloat16), wab_ref[...],
                 preferred_element_type=jnp.float32) + bab_ref[...]   # [T, 2*D2]
    gated = jnp.tanh(ab[:, :d2]) * jax.nn.sigmoid(ab[:, d2:])         # [T, D2] f32

    # ---- attention scores as a lane-dense row: wc_row @ gated^T -> [1, T] ---
    scores = jax.lax.dot_general(
        wc_ref[...], gated,
        dimension_numbers=(((1,), (1,)), ((), ())),
        preferred_element_type=jnp.float32) + bc_ref[0, 0]            # [1, T]

    # A_raw tile (lane-dense store, unmasked; padded lanes sliced off outside)
    a_out_ref[...] = scores

    # ---- online softmax over instances (mask padded rows of the last tile) --
    col = i * tile_n + jax.lax.broadcasted_iota(jnp.int32, (1, tile_n), 1)
    s_masked = jnp.where(col < n_valid, scores, -jnp.inf)

    m_prev = m_sc[...]                                                 # [1, 1]
    m_new = jnp.maximum(m_prev, jnp.max(s_masked, axis=-1, keepdims=True))
    alpha = jnp.exp(m_prev - m_new)                                    # [1, 1]
    p = jnp.exp(s_masked - m_new)                                      # [1, T]
    l_sc[...] = alpha * l_sc[...] + jnp.sum(p, axis=-1, keepdims=True)
    # weighted feature sum as an MXU matmul: [1,T] @ [T,D1] -> [1,D1]
    acc_sc[...] = alpha * acc_sc[...] + jnp.dot(
        p, hf, preferred_element_type=jnp.float32)
    m_sc[...] = m_new

    # ---- finalize: M = softmax(A) @ hf --------------------------------------
    @pl.when(i == pl.num_programs(0) - 1)
    def _finalize():
        m_out_ref[...] = acc_sc[...] / l_sc[...]


def clam_sb_multimodal_forward(h, params, *, tile_n=512):
    """Returns (M, total_inst_loss, all_targets, all_preds, A_raw).

    tile_n default (512) keeps 2 double-buffered bf16 h tiles at ~4 MiB, safe
    under the v5e 16 MiB scoped default and with plenty of headroom on
    v6e/v7x; raise to 1024-2048 on v6e/v7x for large bags.
    """
    N, L = h.shape
    D1 = params["w1"].shape[1]
    D2 = params["wa"].shape[1]

    # ---- host-side prep: bf16 MXU operands, fused gate weights --------------
    h_bf = h.astype(jnp.bfloat16)
    w1_bf = params["w1"].astype(jnp.bfloat16)
    wab_bf = jnp.concatenate([params["wa"], params["wb"]], axis=1).astype(jnp.bfloat16)
    b1 = params["b1"].astype(jnp.float32)
    bab = jnp.concatenate([params["ba"], params["bb"]], axis=1).astype(jnp.float32)
    wc_row = params["wc"].reshape(1, D2).astype(jnp.float32)
    bc = params["bc"].reshape(1, 1).astype(jnp.float32)

    tile_n = max(128, (min(tile_n, 2048) // 128) * 128)
    n_pad = pl.cdiv(N, tile_n) * tile_n
    if n_pad != N:
        h_bf = jnp.pad(h_bf, ((0, n_pad - N), (0, 0)))
    num_tiles = n_pad // tile_n

    kernel = functools.partial(_clam_sb_kernel, n_valid=N)

    # h double-buffered + weights/outputs/scratch headroom
    vmem_limit = int(min(max(4 * tile_n * L + 8 * 2**20, 16 * 2**20), 64 * 2**20))

    cost = pl.CostEstimate(
        flops=int(2 * n_pad * (L * D1 + D1 * 2 * D2 + D2 + D1)),
        transcendentals=int(n_pad * (2 * D2 + 1)),
        bytes_accessed=int(n_pad * L * 2 + (L * D1 + D1 * 2 * D2) * 2
                           + n_pad * 4 + D1 * 4),
    )

    M, A_row = pl.pallas_call(
        kernel,
        out_shape=(
            jax.ShapeDtypeStruct((1, D1), jnp.float32),
            jax.ShapeDtypeStruct((1, n_pad), jnp.float32),
        ),
        grid_spec=pltpu.PrefetchScalarGridSpec(
            num_scalar_prefetch=0,
            grid=(num_tiles,),
            in_specs=[
                pl.BlockSpec((tile_n, L), lambda i: (i, 0)),        # h tile (bf16)
                pl.BlockSpec((L, D1), lambda i: (0, 0)),            # w1 (bf16, resident)
                pl.BlockSpec((1, D1), lambda i: (0, 0)),            # b1 (f32)
                pl.BlockSpec((D1, 2 * D2), lambda i: (0, 0)),       # wa|wb (bf16, resident)
                pl.BlockSpec((1, 2 * D2), lambda i: (0, 0)),        # ba|bb (f32)
                pl.BlockSpec((1, D2), lambda i: (0, 0)),            # wc row (f32)
                pl.BlockSpec(memory_space=pltpu.MemorySpace.SMEM),  # bc scalar
            ],
            out_specs=(
                pl.BlockSpec((1, D1), lambda i: (0, 0)),            # M (resident)
                pl.BlockSpec((1, tile_n), lambda i: (0, i)),        # A_raw row (lane-dense)
            ),
            scratch_shapes=[
                pltpu.VMEM((1, 1), jnp.float32),    # running max
                pltpu.VMEM((1, 1), jnp.float32),    # running denom
                pltpu.VMEM((1, D1), jnp.float32),   # running weighted sum
            ],
        ),
        compiler_params=pltpu.CompilerParams(
            dimension_semantics=("arbitrary",),     # N axis is a softmax reduction
            vmem_limit_bytes=vmem_limit,
        ),
        cost_estimate=cost,
    )(h_bf, w1_bf, b1, wab_bf, bab, wc_row, bc)

    A_raw = A_row[:, :N]  # drop padded lanes; already the PyTorch [1, N] layout
    # TODO(synk): instance_eval branch (top-k instance classifiers + CE loss) is
    # host-side, label-dependent control flow and is not part of the hot path.
    # TODO(synk): on v7x, split the bag across the 2 TensorCores with partial
    # (max, denom, acc) outputs if profiling shows one TC does not saturate HBM.
    total_inst_loss = 0.0
    all_targets, all_preds = [], []
    return M, total_inst_loss, all_targets, all_preds, A_raw


def _init_params(key, L, D1, D2):
    """Deterministic synthetic parameters (shapes from CLAM_SB_multimodal.__init__),
    pre-transposed to [in_features, out_features]."""
    ks = jax.random.split(key, 8)
    scale = 0.02
    return {
        "w1": scale * jax.random.normal(ks[0], (L, D1), jnp.float32),
        "b1": scale * jax.random.normal(ks[1], (1, D1), jnp.float32),
        "wa": scale * jax.random.normal(ks[2], (D1, D2), jnp.float32),
        "ba": scale * jax.random.normal(ks[3], (1, D2), jnp.float32),
        "wb": scale * jax.random.normal(ks[4], (D1, D2), jnp.float32),
        "bb": scale * jax.random.normal(ks[5], (1, D2), jnp.float32),
        "wc": scale * jax.random.normal(ks[6], (D2, 1), jnp.float32),
        "bc": scale * jax.random.normal(ks[7], (1, 1), jnp.float32),
    }


def _reference(h, p):
    """Pure-JAX reference mirroring the kernel's bf16 matmul-input policy."""
    D2 = p["wa"].shape[1]
    h_bf = h.astype(jnp.bfloat16)
    w1_bf = p["w1"].astype(jnp.bfloat16)
    wab_bf = jnp.concatenate([p["wa"], p["wb"]], axis=1).astype(jnp.bfloat16)
    bab = jnp.concatenate([p["ba"], p["bb"]], axis=1)
    hf = jnp.maximum(jnp.dot(h_bf, w1_bf, preferred_element_type=jnp.float32)
                     + p["b1"], 0.0)
    ab = jnp.dot(hf.astype(jnp.bfloat16), wab_bf,
                 preferred_element_type=jnp.float32) + bab
    gated = jnp.tanh(ab[:, :D2]) * jax.nn.sigmoid(ab[:, D2:])
    scores = gated @ p["wc"] + p["bc"]          # [N, 1]
    A_raw = scores.T                            # [1, N]
    A_sm = jax.nn.softmax(A_raw, axis=1)
    M = A_sm @ hf                               # [1, D1]
    return M, A_raw


if __name__ == "__main__":
    # size_arg='small', feat_type='simclr' -> size = [2048, 64, 64]
    L, D1, D2 = 2048, 64, 64
    N = 300  # not a multiple of the tile -> exercises multi-tile grid + masking

    key = jax.random.PRNGKey(0)
    kx, kp = jax.random.split(key)
    h = jax.random.normal(kx, (N, L), jnp.float32)
    params = _init_params(kp, L, D1, D2)

    M, inst_loss, tgts, preds, A_raw = clam_sb_multimodal_forward(
        h, params, tile_n=128)
    M = jax.block_until_ready(M)
    A_raw = jax.block_until_ready(A_raw)

    M_ref, A_ref = _reference(h, params)
    assert M.shape == (1, D1) and A_raw.shape == (1, N)
    assert jnp.allclose(M, M_ref, atol=2e-3, rtol=2e-3), (
        "M mismatch, max abs diff %e" % float(jnp.max(jnp.abs(M - M_ref))))
    assert jnp.allclose(A_raw, A_ref, atol=2e-3, rtol=2e-3), (
        "A_raw mismatch, max abs diff %e" % float(jnp.max(jnp.abs(A_raw - A_ref))))

    print("KERNEL_OK")
</pallas_src>

<mosaic_0001>
module attributes {stable_mosaic.version = 11 : i64} {
  func.func @_clam_sb_kernel(%arg0: i32, %arg1: memref<128x2048xbf16, #tpu.memory_space<vmem>>, %arg2: memref<2048x64xbf16, #tpu.memory_space<vmem>>, %arg3: memref<1x64xf32, #tpu.memory_space<vmem>>, %arg4: memref<64x128xbf16, #tpu.memory_space<vmem>>, %arg5: memref<1x128xf32, #tpu.memory_space<vmem>>, %arg6: memref<1x64xf32, #tpu.memory_space<vmem>>, %arg7: memref<1x1xf32, #tpu.memory_space<smem>>, %arg8: memref<1x64xf32, #tpu.memory_space<vmem>>, %arg9: memref<1x128xf32, #tpu.memory_space<vmem>>, %arg10: memref<1x1xf32, #tpu.memory_space<vmem>>, %arg11: memref<1x1xf32, #tpu.memory_space<vmem>>, %arg12: memref<1x64xf32, #tpu.memory_space<vmem>>) attributes {dimension_semantics = [#tpu.dimension_semantics<arbitrary>], iteration_bounds = array<i64: 3>, scalar_prefetch = 0 : i64, scratch_operands = 3 : i64, tpu.core_type = #tpu.core_type<tc>, window_params = [{transform_indices = @transform_0, window_bounds = array<i64: 128, 2048>}, {pipeline_mode = #tpu.pipeline_mode<synchronous>, transform_indices = @transform_1, window_bounds = array<i64: 2048, 64>}, {pipeline_mode = #tpu.pipeline_mode<synchronous>, transform_indices = @transform_2, window_bounds = array<i64: 1, 64>}, {pipeline_mode = #tpu.pipeline_mode<synchronous>, transform_indices = @transform_3, window_bounds = array<i64: 64, 128>}, {pipeline_mode = #tpu.pipeline_mode<synchronous>, transform_indices = @transform_4, window_bounds = array<i64: 1, 128>}, {pipeline_mode = #tpu.pipeline_mode<synchronous>, transform_indices = @transform_5, window_bounds = array<i64: 1, 64>}, {transform_indices = @transform_6, window_bounds = array<i64: 1, 1>}, {pipeline_mode = #tpu.pipeline_mode<synchronous>, transform_indices = @transform_7, window_bounds = array<i64: 1, 64>}, {transform_indices = @transform_8, window_bounds = array<i64: 1, 128>}]} {
    %c0_i32 = arith.constant 0 : i32
    %0 = arith.cmpi eq, %arg0, %c0_i32 : i32
    %1 = arith.extui %0 : i1 to i32
    %c0_i32_0 = arith.constant 0 : i32
    %2 = arith.cmpi ne, %1, %c0_i32_0 : i32
    scf.if %2 {
      %cst_37 = arith.constant 0xFF800000 : f32
      %65 = vector.broadcast %cst_37 : f32 to vector<1x1xf32>
      %c0_38 = arith.constant 0 : index
      %c0_39 = arith.constant 0 : index
      %66 = vector.load %arg10[%c0_38, %c0_39] : memref<1x1xf32, #tpu.memory_space<vmem>>, vector<1x1xf32>
      tpu.vector_store %arg10[%c0_38, %c0_39], %65 {strides = array<i32>} : memref<1x1xf32, #tpu.memory_space<vmem>>, vector<1x1xf32>,
      %cst_40 = arith.constant 0.000000e+00 : f32
      %67 = vector.broadcast %cst_40 : f32 to vector<1x1xf32>
      %c0_41 = arith.constant 0 : index
      %c0_42 = arith.constant 0 : index
      %68 = vector.load %arg11[%c0_41, %c0_42] : memref<1x1xf32, #tpu.memory_space<vmem>>, vector<1x1xf32>
      tpu.vector_store %arg11[%c0_41, %c0_42], %67 {strides = array<i32>} : memref<1x1xf32, #tpu.memory_space<vmem>>, vector<1x1xf32>,
      %cst_43 = arith.constant 0.000000e+00 : f32
      %69 = vector.broadcast %cst_43 : f32 to vector<1x64xf32>
      %c0_44 = arith.constant 0 : index
      %c0_45 = arith.constant 0 : index
      %70 = vector.load %arg12[%c0_44, %c0_45] : memref<1x64xf32, #tpu.memory_space<vmem>>, vector<1x64xf32>
      tpu.vector_store %arg12[%c0_44, %c0_45], %69 {strides = array<i32>} : memref<1x64xf32, #tpu.memory_space<vmem>>, vector<1x64xf32>,
    } else {
    }
    %c0 = arith.constant 0 : index
    %c0_1 = arith.constant 0 : index
    %3 = vector.load %arg1[%c0, %c0_1] : memref<128x2048xbf16, #tpu.memory_space<vmem>>, vector<128x2048xbf16>
    %c0_2 = arith.constant 0 : index
    %c0_3 = arith.constant 0 : index
    %4 = vector.load %arg2[%c0_2, %c0_3] : memref<2048x64xbf16, #tpu.memory_space<vmem>>, vector<2048x64xbf16>
    %cst = arith.constant dense<0.000000e+00> : vector<128x64xf32>
    %5 = tpu.matmul %3, %4, %cst {dimension_numbers = #tpu.dot_dimension_numbers<[1], [0], [0], [1], [0, 0, 1, 1], [], []>} : vector<128x2048xbf16>, vector<2048x64xbf16>, vector<128x64xf32> -> vector<128x64xf32>
    %c0_4 = arith.constant 0 : index
    %c0_5 = arith.constant 0 : index
    %6 = vector.load %arg3[%c0_4, %c0_5] : memref<1x64xf32, #tpu.memory_space<vmem>>, vector<1x64xf32>
    %7 = vector.broadcast %6 : vector<1x64xf32> to vector<128x64xf32>
    %8 = arith.addf %5, %7 : vector<128x64xf32>
    %cst_6 = arith.constant 0.000000e+00 : f32
    %9 = vector.broadcast %cst_6 : f32 to vector<128x64xf32>
    %10 = arith.maximumf %8, %9 : vector<128x64xf32>
    %11 = arith.truncf %10 : vector<128x64xf32> to vector<128x64xbf16>
    %c0_7 = arith.constant 0 : index
    %c0_8 = arith.constant 0 : index
    %12 = vector.load %arg4[%c0_7, %c0_8] : memref<64x128xbf16, #tpu.memory_space<vmem>>, vector<64x128xbf16>
    %cst_9 = arith.constant dense<0.000000e+00> : vector<128x128xf32>
    %13 = tpu.matmul %11, %12, %cst_9 {dimension_numbers = #tpu.dot_dimension_numbers<[1], [0], [0], [1], [0, 0, 1, 1], [], []>} : vector<128x64xbf16>, vector<64x128xbf16>, vector<128x128xf32> -> vector<128x128xf32>
    %c0_10 = arith.constant 0 : index
    %c0_11 = arith.constant 0 : index
    %14 = vector.load %arg5[%c0_10, %c0_11] : memref<1x128xf32, #tpu.memory_space<vmem>>, vector<1x128xf32>
    %15 = vector.broadcast %14 : vector<1x128xf32> to vector<128x128xf32>
    %16 = arith.addf %13, %15 : vector<128x128xf32>
    %17 = vector.extract_strided_slice %16 {offsets = [0, 0], sizes = [128, 64], strides = [1, 1]} : vector<128x128xf32> to vector<128x64xf32>
    %18 = math.tanh %17 : vector<128x64xf32>
    %19 = vector.extract_strided_slice %16 {offsets = [0, 64], sizes = [128, 64], strides = [1, 1]} : vector<128x128xf32> to vector<128x64xf32>
    %20 = arith.negf %19 : vector<128x64xf32>
    %21 = math.exp %20 : vector<128x64xf32>
    %cst_12 = arith.constant 1.000000e+00 : f32
    %22 = vector.broadcast %cst_12 : f32 to vector<128x64xf32>
    %23 = arith.addf %22, %21 : vector<128x64xf32>
    %24 = arith.divf %22, %23 : vector<128x64xf32>
    %25 = arith.mulf %18, %24 : vector<128x64xf32>
    %c0_13 = arith.constant 0 : index
    %c0_14 = arith.constant 0 : index
    %26 = vector.load %arg6[%c0_13, %c0_14] : memref<1x64xf32, #tpu.memory_space<vmem>>, vector<1x64xf32>
    %cst_15 = arith.constant dense<0.000000e+00> : vector<1x128xf32>
    %27 = tpu.matmul %26, %25, %cst_15 {dimension_numbers = #tpu.dot_dimension_numbers<[1], [1], [0], [0], [0, 0, 1, 0], [], []>} : vector<1x64xf32>, vector<128x64xf32>, vector<1x128xf32> -> vector<1x128xf32>
    %c0_16 = arith.constant 0 : index
    %c0_17 = arith.constant 0 : index
    %28 = memref.load %arg7[%c0_16, %c0_17] : memref<1x1xf32, #tpu.memory_space<smem>>
    %29 = vector.broadcast %28 : f32 to vector<1x128xf32>
    %30 = arith.addf %27, %29 : vector<1x128xf32>
    %c0_18 = arith.constant 0 : index
    %c0_19 = arith.constant 0 : index
    %31 = vector.load %arg9[%c0_18, %c0_19] : memref<1x128xf32, #tpu.memory_space<vmem>>, vector<1x128xf32>
    tpu.vector_store %arg9[%c0_18, %c0_19], %30 {strides = array<i32>} : memref<1x128xf32, #tpu.memory_space<vmem>>, vector<1x128xf32>,
    %c128_i32 = arith.constant 128 : i32
    %32 = arith.muli %arg0, %c128_i32 : i32
    %33 = tpu.iota {dimensions = array<i32: 1>} : vector<1x128xi32>
    %34 = vector.broadcast %32 : i32 to vector<1x128xi32>
    %35 = arith.addi %34, %33 : vector<1x128xi32>
    %c300_i32 = arith.constant 300 : i32
    %36 = vector.broadcast %c300_i32 : i32 to vector<1x128xi32>
    %37 = arith.cmpi slt, %35, %36 : vector<1x128xi32>
    %cst_20 = arith.constant 0xFF800000 : f32
    %38 = vector.broadcast %cst_20 : f32 to vector<1x128xf32>
    %39 = arith.select %37, %30, %38 : vector<1x128xi1>, vector<1x128xf32>
    %c0_21 = arith.constant 0 : index
    %c0_22 = arith.constant 0 : index
    %40 = vector.load %arg10[%c0_21, %c0_22] : memref<1x1xf32, #tpu.memory_space<vmem>>, vector<1x1xf32>
    %cst_23 = arith.constant dense<0xFF800000> : vector<1xf32>
    %41 = vector.multi_reduction <maximumf>, %39, %cst_23 [1] : vector<1x128xf32> to vector<1xf32>
    %42 = vector.shape_cast %41 : vector<1xf32> to vector<1x1xf32>
    %43 = arith.maximumf %40, %42 : vector<1x1xf32>
    %44 = arith.subf %40, %43 : vector<1x1xf32>
    %45 = math.exp %44 : vector<1x1xf32>
    %46 = vector.broadcast %43 : vector<1x1xf32> to vector<1x128xf32>
    %47 = arith.subf %39, %46 : vector<1x128xf32>
    %48 = math.exp %47 : vector<1x128xf32>
    %c0_24 = arith.constant 0 : index
    %c0_25 = arith.constant 0 : index
    %49 = vector.load %arg11[%c0_24, %c0_25] : memref<1x1xf32, #tpu.memory_space<vmem>>, vector<1x1xf32>
    %50 = arith.mulf %45, %49 : vector<1x1xf32>
    %cst_26 = arith.constant dense<0.000000e+00> : vector<1xf32>
    %51 = vector.multi_reduction <add>, %48, %cst_26 [1] : vector<1x128xf32> to vector<1xf32>
    %52 = vector.shape_cast %51 : vector<1xf32> to vector<1x1xf32>
    %53 = arith.addf %50, %52 : vector<1x1xf32>
    %c0_27 = arith.constant 0 : index
    %c0_28 = arith.constant 0 : index
    %54 = vector.load %arg11[%c0_27, %c0_28] : memref<1x1xf32, #tpu.memory_space<vmem>>, vector<1x1xf32>
    tpu.vector_store %arg11[%c0_27, %c0_28], %53 {strides = array<i32>} : memref<1x1xf32, #tpu.memory_space<vmem>>, vector<1x1xf32>,
    %c0_29 = arith.constant 0 : index
    %c0_30 = arith.constant 0 : index
    %55 = vector.load %arg12[%c0_29, %c0_30] : memref<1x64xf32, #tpu.memory_space<vmem>>, vector<1x64xf32>
    %56 = vector.broadcast %45 : vector<1x1xf32> to vector<1x64xf32>
    %57 = arith.mulf %56, %55 : vector<1x64xf32>
    %cst_31 = arith.constant dense<0.000000e+00> : vector<1x64xf32>
    %58 = tpu.matmul %48, %10, %cst_31 {dimension_numbers = #tpu.dot_dimension_numbers<[1], [0], [0], [1], [0, 0, 1, 1], [], []>} : vector<1x128xf32>, vector<128x64xf32>, vector<1x64xf32> -> vector<1x64xf32>
    %59 = arith.addf %57, %58 : vector<1x64xf32>
    %c0_32 = arith.constant 0 : index
    %c0_33 = arith.constant 0 : index
    %60 = vector.load %arg12[%c0_32, %c0_33] : memref<1x64xf32, #tpu.memory_space<vmem>>, vector<1x64xf32>
    tpu.vector_store %arg12[%c0_32, %c0_33], %59 {strides = array<i32>} : memref<1x64xf32, #tpu.memory_space<vmem>>, vector<1x64xf32>,
    %c0_34 = arith.constant 0 : index
    %c0_35 = arith.constant 0 : index
    %61 = vector.load %arg10[%c0_34, %c0_35] : memref<1x1xf32, #tpu.memory_space<vmem>>, vector<1x1xf32>
    tpu.vector_store %arg10[%c0_34, %c0_35], %43 {strides = array<i32>} : memref<1x1xf32, #tpu.memory_space<vmem>>, vector<1x1xf32>,
    %c2_i32 = arith.constant 2 : i32
    %62 = arith.cmpi eq, %arg0, %c2_i32 : i32
    %63 = arith.extui %62 : i1 to i32
    %c0_i32_36 = arith.constant 0 : i32
    %64 = arith.cmpi ne, %63, %c0_i32_36 : i32
    scf.if %64 {
      %c0_37 = arith.constant 0 : index
      %c0_38 = arith.constant 0 : index
      %65 = vector.load %arg12[%c0_37, %c0_38] : memref<1x64xf32, #tpu.memory_space<vmem>>, vector<1x64xf32>
      %c0_39 = arith.constant 0 : index
      %c0_40 = arith.constant 0 : index
      %66 = vector.load %arg11[%c0_39, %c0_40] : memref<1x1xf32, #tpu.memory_space<vmem>>, vector<1x1xf32>
      %67 = vector.broadcast %66 : vector<1x1xf32> to vector<1x64xf32>
      %68 = arith.divf %65, %67 : vector<1x64xf32>
      %c0_41 = arith.constant 0 : index
      %c0_42 = arith.constant 0 : index
      %69 = vector.load %arg8[%c0_41, %c0_42] : memref<1x64xf32, #tpu.memory_space<vmem>>, vector<1x64xf32>
      tpu.vector_store %arg8[%c0_41, %c0_42], %68 {strides = array<i32>} : memref<1x64xf32, #tpu.memory_space<vmem>>, vector<1x64xf32>,
    } else {
    }
    return
  }
  func.func @transform_0(%arg0: i32) -> (i32, i32) {
    %c0_i32 = arith.constant 0 : i32
    %c0_i32_0 = arith.constant 0 : i32
    return %arg0, %c0_i32 : i32, i32
  }
  func.func @transform_1(%arg0: i32) -> (i32, i32) {
    %c0_i32 = arith.constant 0 : i32
    %c0_i32_0 = arith.constant 0 : i32
    %c0_i32_1 = arith.constant 0 : i32
    return %c0_i32, %c0_i32_0 : i32, i32
  }
  func.func @transform_2(%arg0: i32) -> (i32, i32) {
    %c0_i32 = arith.constant 0 : i32
    %c0_i32_0 = arith.constant 0 : i32
    %c0_i32_1 = arith.constant 0 : i32
    return %c0_i32, %c0_i32_0 : i32, i32
  }
  func.func @transform_3(%arg0: i32) -> (i32, i32) {
    %c0_i32 = arith.constant 0 : i32
    %c0_i32_0 = arith.constant 0 : i32
    %c0_i32_1 = arith.constant 0 : i32
    return %c0_i32, %c0_i32_0 : i32, i32
  }
  func.func @transform_4(%arg0: i32) -> (i32, i32) {
    %c0_i32 = arith.constant 0 : i32
    %c0_i32_0 = arith.constant 0 : i32
    %c0_i32_1 = arith.constant 0 : i32
    return %c0_i32, %c0_i32_0 : i32, i32
  }
  func.func @transform_5(%arg0: i32) -> (i32, i32) {
    %c0_i32 = arith.constant 0 : i32
    %c0_i32_0 = arith.constant 0 : i32
    %c0_i32_1 = arith.constant 0 : i32
    return %c0_i32, %c0_i32_0 : i32, i32
  }
  func.func @transform_6(%arg0: i32) -> (i32, i32) {
    %c0_i32 = arith.constant 0 : i32
    %c0_i32_0 = arith.constant 0 : i32
    %c0_i32_1 = arith.constant 0 : i32
    return %c0_i32, %c0_i32_0 : i32, i32
  }
  func.func @transform_7(%arg0: i32) -> (i32, i32) {
    %c0_i32 = arith.constant 0 : i32
    %c0_i32_0 = arith.constant 0 : i32
    %c0_i32_1 = arith.constant 0 : i32
    return %c0_i32, %c0_i32_0 : i32, i32
  }
  func.func @transform_8(%arg0: i32) -> (i32, i32) {
    %c0_i32 = arith.constant 0 : i32
    %c0_i32_0 = arith.constant 0 : i32
    return %c0_i32, %arg0 : i32, i32
  }
}

</mosaic_0001>

<bundles_post_ra>
// kernel: tpu_custom_call.1
= control target key start
LH: loop header
LB: loop body
LE: loop exit
PB: predicated region body
PF: predicated region fallthrough
CT: control target
= control target key end

     0   :  { %s6565_s0 = inlined_call_operand.hbm [shape: bf16[384,2048], index: 0, kind: input, shape index: {}]   ;;  %s6566_s1 = inlined_call_operand.vmem [shape: bf16[2048,64], index: 1, kind: input, shape index: {}]   ;;  %s6567_s2 = inlined_call_operand.hbm [shape: f32[1,64], index: 2, kind: input, shape index: {}]   ;;  %s6568_s3 = inlined_call_operand.hbm [shape: bf16[64,128], index: 3, kind: input, shape index: {}]   ;;  %s6569_s4 = inlined_call_operand.hbm [shape: f32[1,128], index: 4, kind: input, shape index: {}]   ;;  %s6570_s5 = inlined_call_operand.hbm [shape: f32[1,64], index: 5, kind: input, shape index: {}]   ;;  %s6571_s6 = inlined_call_operand.<no memory space> [shape: f32[1,1], index: 6, kind: input, shape index: {}]   ;;  %s6572_s7 = inlined_call_operand.hbm [shape: f32[1,64], index: 7, kind: output, shape index: {0}]   ;;  %s6573_s8 = inlined_call_operand.hbm [shape: f32[1,384], index: 8, kind: output, shape index: {1}]  }
   0x1   :  { %6577 = sst [smem:[#allocation23_spill]] %s6567_s2 }
   0x2   :  { %14 = sst [smem:[#allocation5]] %s6571_s6 }
   0x3   :  { %15 = vsyncpa [#allocation7], 0 }
   0x4   :  { %17 = vsyncpa [#allocation7 + $0x1], 0 }
   0x5   :  { %18 = vsyncpa [#allocation10], 0 }
   0x6   :  { %19 = vsyncpa [#allocation13], 0 }
   0x7   :  { %20 = vsyncpa [#allocation8], 0 }
   0x8   :  { %21 = vsyncpa [#allocation17], 0 }
   0x9   :  { %23 = vsyncpa [#allocation17 + $0x1], 0  ;;  %s5438_s29 = smov 0   ;;  %s5440_s30 = smov 0  }
   0xa   :  { %s5442_s9 = smov 0   ;;  %s5444_s10 = smov 0  }
   0xb LB: > { %s5459_s6 = sadd.s32 4294967295, %s5370_s10   ;;  %s3744_s11 = sadd.s32 4294967294, %s5370_s10   ;;  %s5370_s10 = sphi %s5444_s10, %s6604_s10   ;;  %s5366_s9 = sphi %s5442_s9, %s6603_s9   ;;  %s5362_s30 = sphi %s5440_s30, %s6602_s30   ;;  %s5358_s29 = sphi %s5438_s29, %s6601_s29  }
   0xc   : > { %p49_p0 = scmp.ne.s32.totalorder %s5362_s30, %s5358_s29  ;;  %p6574_p1 = scmp.eq.s32.totalorder %s5459_s6, 0 }
   0xd   : > { %p226_p3 = scmp.eq.s32.totalorder %s3744_s11, 2  ;;  %p3745_p5 = scmp.ge.s32.totalorder %s5370_s10, 1 }
   0xe   : > { %p5468_p4 = por %p6574_p1, %p49_p0  ;;  %p233_p7 = scmp.lt.s32.totalorder %s5370_s10, 4 }
   0xf   : > { %p5473_p6 = por %p226_p3, %p49_p0  ;;  %s5372_s15 = smov [#allocation9]  }
  0x10   : > { %s6578_s12 = scalar_select %p5468_p4, 1, 0 }
  0x11   : > { %s6579_s13 = scalar_select %p5473_p6, 1, 0 }
  0x12   : > { %p5479_p9 = pnand %p3745_p5, %p233_p7  ;;  %s249_s16 = sshll.u32 %s5372_s15, 4  ;;  %s250_s16 = int_to_ptr.vmem [resolvable:$true] %s249_s16 }
  0x13   : > { %s5373_s17 = smov [#allocation12]   ;;  %s5374_s20 = smov [#allocation11]  }
  0x14   : > { %s6580_s14 = scalar_select %p5479_p9, 1, 0 }
  0x15   : > { %p4806_p10 = pneg %p5479_p9  ;;  %s273_s18 = sshll.u32 %s5373_s17, 4  ;;  %s5491_s18 = int_to_ptr.vmem [resolvable:$true] %s273_s18 }
  0x16   : > { %s259_s21 = sshll.u32 %s5374_s20, 4  ;;  %s6582_s2 = sld [smem:[#allocation23_spill]]  ;;  %s5493_s21 = int_to_ptr.vmem [resolvable:$true] %s259_s21 }
  0x17   : > { %p5487_p11 = pnand %p4806_p10, %p6574_p1 }
  0x19   : > { %p5503_p13 = pneg %p5487_p11 }
  0x1c   : > { %s5124_s24 = scalar_lea.hbm %s6582_s2, 16 }
  0x1d   : > { %p5125_p12 = scmp.ne.s32.totalorder %s6582_s2, %s5124_s24  ;;  %p5131_p5 = scmp.lt.u32.totalorder %s5124_s24, %s6582_s2 }
  0x1f   : > { %p5127_p0 = pnand %p5503_p13, %p5125_p12 }
  0x21   : > { %p5128_p3 = pneg %p5127_p0 }
  0x23   : > { %p5133_p7 = pnand %p5131_p5, %p5128_p3 }
  0x25   : > { %5136 = shalt.err (!%p5133_p7)
}
  0x26   : > { %s5137_s15 = scalar_lea.vmem %s250_s16, 16  ;;  %s5144_s17 = scalar_lea.vmem %s250_s16, 32 }
  0x27   : > { %p5138_p10 = scmp.ne.s32.totalorder %s250_s16, %s5137_s15  ;;  %p5145_p2 = scmp.lt.s32.totalorder %s250_s16, %s250_s16 }
  0x28   : > { %p5146_p6 = scmp.lt.s32.totalorder %s5144_s17, %s5137_s15 }
  0x29   : > { %p5140_p8 = pnand %p5138_p10, %p5503_p13 }
  0x2a   : > { %p5147_p4 = por %p5146_p6, %p5145_p2 }
  0x2b   : > { %p5141_p1 = pneg %p5140_p8 }
  0x2d   : > { %p5148_p9 = pnand %p5147_p4, %p5141_p1 }
  0x2f   : > { %5151 = shalt.err (!%p5148_p9)
}
  0x30   : > { %4809 = dma.hbm_to_vmem [thread:$0]  (!%p5487_p11), %s6582_s2, 16, %s250_s16, [#allocation10]  }
  0x31   : > { %s5152_s25 = scalar_lea.hbm %s6569_s4, 16 }
  0x32   : > { %p5153_p8 = scmp.ne.s32.totalorder %s6569_s4, %s5152_s25  ;;  %p5159_p1 = scmp.lt.u32.totalorder %s5152_s25, %s6569_s4 }
  0x34   : > { %p5155_p12 = pnand %p5153_p8, %p5503_p13 }
  0x36   : > { %p5156_p2 = pneg %p5155_p12 }
  0x38   : > { %p5161_p4 = pnand %p5159_p1, %p5156_p2 }
  0x3a   : > { %5164 = shalt.err (!%p5161_p4)
}
  0x3b   : > { %s5165_s16 = scalar_lea.vmem %s5491_s18, 16  ;;  %s5172_s17 = scalar_lea.vmem %s5491_s18, 32 }
  0x3c   : > { %p5166_p6 = scmp.ne.s32.totalorder %s5491_s18, %s5165_s16  ;;  %p5173_p3 = scmp.lt.s32.totalorder %s5491_s18, %s5491_s18 }
  0x3d   : > { %p5174_p5 = scmp.lt.s32.totalorder %s5172_s17, %s5165_s16 }
  0x3e   : > { %p5168_p9 = pnand %p5166_p6, %p5503_p13 }
  0x3f   : > { %p5175_p7 = por %p5174_p5, %p5173_p3 }
  0x40   : > { %p5169_p0 = pneg %p5168_p9 }
  0x42   : > { %p5176_p10 = pnand %p5175_p7, %p5169_p0 }
  0x44   : > { %5179 = shalt.err (!%p5176_p10)
}
  0x45   : > { %4815 = dma.hbm_to_vmem [thread:$0]  (!%p5487_p11), %s6569_s4, 16, %s5491_s18, [#allocation13]  }
  0x46   : > { %s5180_s25 = scalar_lea.hbm %s6568_s3, 512 }
  0x47   : > { %p5181_p8 = scmp.ne.s32.totalorder %s6568_s3, %s5180_s25  ;;  %p5187_p1 = scmp.lt.u32.totalorder %s5180_s25, %s6568_s3 }
  0x49   : > { %p5183_p12 = pnand %p5181_p8, %p5503_p13 }
  0x4b   : > { %p5184_p2 = pneg %p5183_p12 }
  0x4d   : > { %p5189_p4 = pnand %p5187_p1, %p5184_p2 }
  0x4f   : > { %5192 = shalt.err (!%p5189_p4)
}
  0x50   : > { %s5193_s18 = scalar_lea.vmem %s5493_s21, 512  ;;  %p5201_p3 = scmp.lt.s32.totalorder %s5493_s21, %s5493_s21 }
  0x51   : > { %p5194_p6 = scmp.ne.s32.totalorder %s5493_s21, %s5193_s18  ;;  %p5202_p5 = scmp.lt.s32.totalorder %s5193_s18, %s5193_s18 }
  0x53   : > { %p5196_p9 = pnand %p5194_p6, %p5503_p13  ;;  %p5203_p7 = por %p5202_p5, %p5201_p3 }
  0x55   : > { %p5197_p0 = pneg %p5196_p9 }
  0x57   : > { %p5204_p10 = pnand %p5203_p7, %p5197_p0 }
  0x59   : > { %5207 = shalt.err (!%p5204_p10)
}
  0x5a   : > { %s5375_s16 = smov 64   ;;  %s5376_s17 = smov 4  }
  0x5b   : > { %4812 = dma.hbm_to_vmem [thread:$0]  (!%p5487_p11), %s6568_s3, 512, %s5493_s21, [#allocation10], %s5375_s16, %s5375_s16, %s5376_s17  }
  0x5c   : > { %s5377_s23 = smov [#allocation14]   ;;  %s5208_s28 = scalar_lea.hbm %s6570_s5, 16 }
  0x5d   : > { %s284_s24 = sshll.u32 %s5377_s23, 4  ;;  %p5209_p8 = scmp.ne.s32.totalorder %s6570_s5, %s5208_s28  ;;  %s285_s24 = int_to_ptr.vmem [resolvable:$true] %s284_s24 }
  0x5e   : > { %p5215_p1 = scmp.lt.u32.totalorder %s5208_s28, %s6570_s5 }
  0x5f   : > { %p5211_p12 = pnand %p5209_p8, %p5503_p13 }
  0x61   : > { %p5212_p2 = pneg %p5211_p12 }
  0x63   : > { %p5217_p4 = pnand %p5215_p1, %p5212_p2 }
  0x65   : > { %5220 = shalt.err (!%p5217_p4)
}
  0x66   : > { %s5221_s21 = scalar_lea.vmem %s285_s24, 16  ;;  %s5228_s17 = scalar_lea.vmem %s285_s24, 32 }
  0x67   : > { %p5222_p6 = scmp.ne.s32.totalorder %s285_s24, %s5221_s21  ;;  %p5229_p3 = scmp.lt.s32.totalorder %s285_s24, %s285_s24 }
  0x68   : > { %p5230_p5 = scmp.lt.s32.totalorder %s5228_s17, %s5221_s21 }
  0x69   : > { %p5224_p9 = pnand %p5222_p6, %p5503_p13 }
  0x6a   : > { %p5231_p7 = por %p5230_p5, %p5229_p3 }
  0x6b   : > { %p5225_p0 = pneg %p5224_p9 }
  0x6d   : > { %p5232_p10 = pnand %p5231_p7, %p5225_p0 }
  0x6f   : > { %5235 = shalt.err (!%p5232_p10)
}
  0x70   : > { %4818 = dma.hbm_to_vmem [thread:$0]  (!%p5487_p11), %s6570_s5, 16, %s285_s24, [#allocation13]  }
  0x71   : > { %s5587_s2 = sadd.s32 1, %s5370_s10   ;;  %s36_s27 = sadd.s32 1, %s5366_s9 }
  0x72   : > { %s33_s19 = ssub.s32 %s5370_s10, %s5587_s2  ;;  %p43_p13 = scmp.ne.s32.totalorder %s5366_s9, %s5362_s30 }
  0x73   : > { %p34_p8 = scmp.eq.s32.totalorder %s33_s19, 0  ;;  %p44_p12 = scmp.eq.s32.totalorder %s5370_s10, 0 }
  0x74   : > { %p6584_p2 = scmp.eq.s32.totalorder %s5459_s6, 2  ;;  %p4831_p4 = scmp.lt.s32.totalorder %s5370_s10, 3 }
  0x75   : > { %s5603_s25 = scalar_select %p34_p8, %s5366_s9, %s36_s27  }
  0x76   : > { %p5597_p1 = por %p6584_p2, %p43_p13  ;;  %p45_p6 = por %p44_p12, %p43_p13 }
  0x77   : > { %s298_s26 = sand.u32 1, %s5366_s9   ;;  %s4073_s24 = sshll.u32 %s5370_s10, 14 }
  0x78   : > { %s3751_s28 = sshll.u32 %s298_s26, 10  ;;  %s5610_s18 = scalar_lea.hbm %s6565_s0, %s4073_s24 }
  0x79   : > { %s302_s21 = scalar_lea.vmem [#allocation6], %s3751_s28  ;;  %p5614_p11 = pnand %p4831_p4, %p45_p6 }
  0x7a   : > { %s310_s17 = sshll.u32 %s302_s21, 4  ;;  %s5618_s22 = scalar_lea.sflag [#allocation7], %s298_s26  ;;  %s5612_s17 = int_to_ptr.vmem [resolvable:$true] %s310_s17 }
  0x7b   : > { %s5236_s27 = scalar_lea.hbm %s5610_s18, 16384  ;;  %p5238_p0 = pneg %p5614_p11 }
  0x7c   : > { %p5237_p9 = scmp.ne.s32.totalorder %s5610_s18, %s5236_s27  ;;  %s5241_s24 = scalar_lea.hbm %s6565_s0, 49152 }
  0x7d   : > { %p5242_p7 = scmp.lt.u32.totalorder %s5610_s18, %s6565_s0  ;;  %p5243_p10 = scmp.lt.u32.totalorder %s5241_s24, %s5236_s27 }
  0x7e   : > { %p5239_p3 = pnand %p5238_p0, %p5237_p9  ;;  %p5245_p8 = scmp.lt.u32.totalorder %s5236_s27, %s5610_s18 }
  0x7f   : > { %p5244_p13 = por %p5243_p10, %p5242_p7 }
  0x80   : > { %p5240_p5 = pneg %p5239_p3 }
  0x81   : > { %p5246_p12 = por %p5245_p8, %p5244_p13 }
  0x83   : > { %p5247_p2 = pnand %p5246_p12, %p5240_p5 }
  0x85   : > { %5250 = shalt.err (!%p5247_p2)
}
  0x86   : > { %s5251_s26 = scalar_lea.vmem %s5612_s17, 16384  ;;  %s5378_s21 = smov [#allocation6]  }
  0x87   : > { %p5252_p4 = scmp.ne.s32.totalorder %s5612_s17, %s5251_s26  ;;  %s5256_s19 = sshll.u32 %s5378_s21, 4  ;;  %s5257_s19 = int_to_ptr.vmem [resolvable:$false] %s5256_s19 }
  0x88   : > { %s5258_s28 = scalar_lea.vmem %s5257_s19, 32768  ;;  %p5259_p3 = scmp.lt.s32.totalorder %s5612_s17, %s5257_s19 }
  0x89   : > { %p5254_p6 = pnand %p5252_p4, %p5238_p0  ;;  %p5260_p7 = scmp.lt.s32.totalorder %s5258_s28, %s5251_s26 }
  0x8b   : > { %p5255_p9 = pneg %p5254_p6  ;;  %p5261_p10 = por %p5260_p7, %p5259_p3 }
  0x8d   : > { %p5262_p13 = pnand %p5261_p10, %p5255_p9 }
  0x8f   : > { %5265 = shalt.err (!%p5262_p13)
}
  0x90   : > { %s5379_s27 = smov 1024   ;;  %p6587_p0 = scmp.ne.s32.totalorder %s6580_s14, 0 }
  0x91   : > { %4822 = dma.hbm_to_vmem [thread:$0]  (!%p5614_p11), %s5610_s18, 16384, %s5612_s17, %s5618_s22, %s5379_s27, %s5379_s27, %s5375_s16  }
  0x92   : > { %322 = sbr.rel (%p6587_p0) target bundleno = 1911 (0x777), region = 48  ;;  %s5650_s24 = sand.u32 (!%p6587_p0), 1, %s5362_s30  }
  0x93   : > { %s3756_s11 = sshll.u32 (!%p6587_p0), %s5650_s24, 10  ;;  %s325_s15 = scalar_lea.sflag (!%p6587_p0), [#allocation7], %s5650_s24 }
  0x94   : > { %s5654_s26 = scalar_lea.vmem (!%p6587_p0), [#allocation6], %s3756_s11  ;;  %p6588_p5 = scmp.ne.s32.totalorder (!%p6587_p0), %s6578_s12, 0 }
  0x99   : > { %5337 = dma.done.wait (%p6588_p5), %s325_s15, 16384  }
  0x9a   : > { %5339 = vsyncadd (%p6588_p5), %s325_s15, 4294950912  ;;  %p6589_p11 = scmp.eq.s32.totalorder %s5459_s6, 0 }
  0x9c   : > { %5341 = dma.done.wait (%p6589_p11), [#allocation10], 528   ;;  %p6590_p8 = pmov %p6589_p11 }
  0x9e   : > { %5343 = vsyncadd (%p6590_p8), [#allocation10], 4294966768  ;;  %p6591_p12 = pmov %p6590_p8 }
  0x9f   : > { %p6592_p2 = pmov %p6590_p8 }
  0xa0   : > { %5345 = dma.done.wait (%p6591_p12), [#allocation13], 32  }
  0xa1   : > { %5347 = vsyncadd (%p6592_p2), [#allocation13], 4294967264  ;;  %s375_s14 = scalar_lea.vmem [#allocation16], %s5650_s24  ;;  %p6593_p4 = scmp.ne.s32.totalorder %s5459_s6, 0 }
  0xa2   : > { %vm382_vm0 = vcmask (!%p6593_p4), 0   ;;  %vm385_vm1 = vcmask (!%p6593_p4), 516096   ;;  %v5380_v0 = vmov (!%p6593_p4), -inf   ;;  %v5381_v1 = vmov (!%p6593_p4), 0.0  }
  0xa3   : > { %381 = sbr.rel (%p6593_p4) target bundleno = 170 (0xaa), region = 72  ;;  %383 = vst.msk [vmem:[#allocation2] sm:$0x1] (!%p6593_p4), %vm382_vm0, %v5380_v0  ;;  %384 = vst.msk [vmem:[#allocation3] sm:$0x1] (!%p6593_p4), %vm382_vm0, %v5381_v1 }
  0xa4   : > { %386 = vst.msk [vmem:[#allocation4] sm:$0x1] (!%p6593_p4), %vm385_vm1, %v5381_v1 }
  0xaa PF: > { %v4889_v2 = vld [vmem:[%s6566_s1 + $0x40] sm:$0xff]   ;;  %v4893_v6 = vld [vmem:[%s6566_s1 + $0x48] sm:$0xff]   ;;  %v4897_v10 = vld [vmem:[%s6566_s1 + $0x50] sm:$0xff]   ;;  %vm3025_vm2 = vcmask 523264   ;;  %vm5384_vm3 = vmmov 0   ;;  %s3340_s20 = sld [smem:[#allocation5]] }
  0xab   : > { %v4890_v3 = vld [vmem:[%s6566_s1 + $0xc0] sm:$0xff]   ;;  %4074 = vmatprep.subr.bf16.mxu0 %v4889_v2  ;;  %v4894_v7 = vld [vmem:[%s6566_s1 + $0xc8] sm:$0xff]   ;;  %v4898_v11 = vld [vmem:[%s6566_s1 + $0xd0] sm:$0xff]   ;;  %s4065_s22 = sshll.u32 %s5459_s6, 7  ;;  %vm3472_vm6 = vcmask 1040384   ;;  %vm3498_vm7 = vcmask 0  }
  0xac   : > { %v4891_v4 = vld [vmem:[%s6566_s1] sm:$0xff]   ;;  %4138 = vmatprep.subr.bf16.mxu1 %v4890_v3  ;;  %v4895_v8 = vld [vmem:[%s6566_s1 + $0x8] sm:$0xff]   ;;  %v4899_v12 = vld [vmem:[%s6566_s1 + $0x10] sm:$0xff]   ;;  %vm3582_vm8 = vcmask 516096   ;;  %p4066_p6 = scmp.ne.s32.totalorder %s5459_s6, 2 }
  0xad   : > { %v4892_v5 = vld [vmem:[%s6566_s1 + $0x80] sm:$0xff]   ;;  %4075 = vmatpush3.bf16.msra.mxu0 %v4891_v4  ;;  %v4896_v9 = vld [vmem:[%s6566_s1 + $0x88] sm:$0xff]   ;;  %v4900_v13 = vld [vmem:[%s6566_s1 + $0x90] sm:$0xff]  }
  0xae   : > { %4139 = vmatpush3.bf16.msra.mxu1 %v4892_v5  ;;  %4076 = vmatprep.subr.bf16.mxu0 %v4893_v6  ;;  %v4901_v14 = vld [vmem:[%s6566_s1 + $0x58] sm:$0xff]   ;;  %v4905_v18 = vld [vmem:[%s6566_s1 + $0x60] sm:$0xff]   ;;  %v4909_v22 = vld [vmem:[%s6566_s1 + $0x68] sm:$0xff]  }
  0xaf   : > { %4140 = vmatprep.subr.bf16.mxu1 %v4894_v7  ;;  %v4902_v15 = vld [vmem:[%s6566_s1 + $0xd8] sm:$0xff]   ;;  %v4906_v19 = vld [vmem:[%s6566_s1 + $0xe0] sm:$0xff]   ;;  %v4910_v23 = vld [vmem:[%s6566_s1 + $0xe8] sm:$0xff]  }
  0xb0   : > { %v4903_v16 = vld [vmem:[%s6566_s1 + $0x18] sm:$0xff]   ;;  %v4907_v20 = vld [vmem:[%s6566_s1 + $0x20] sm:$0xff]   ;;  %v4911_v24 = vld [vmem:[%s6566_s1 + $0x28] sm:$0xff]  }
  0xb1   : > { %4077 = vmatpush3.bf16.msra.mxu0 %v4895_v8  ;;  %v4904_v17 = vld [vmem:[%s6566_s1 + $0x98] sm:$0xff]   ;;  %v4908_v21 = vld [vmem:[%s6566_s1 + $0xa0] sm:$0xff]   ;;  %v4912_v25 = vld [vmem:[%s6566_s1 + $0xa8] sm:$0xff]  }
  0xb2   : > { %4141 = vmatpush3.bf16.msra.mxu1 %v4896_v9  ;;  %4078 = vmatprep.subr.bf16.mxu0 %v4897_v10  ;;  %v4913_v26 = vld [vmem:[%s6566_s1 + $0x70] sm:$0xff]   ;;  %v4917_v30 = vld [vmem:[%s6566_s1 + $0x78] sm:$0xff]   ;;  %v387_v34 = vld [vmem:[%s5654_s26] sm:$0xff] }
  0xb3   : > { %4142 = vmatprep.subr.bf16.mxu1 %v4898_v11  ;;  %v4914_v27 = vld [vmem:[%s6566_s1 + $0xf0] sm:$0xff]   ;;  %v4918_v31 = vld [vmem:[%s6566_s1 + $0xf8] sm:$0xff]   ;;  %v395_v35 = vld [vmem:[%s5654_s26 + $0x40] sm:$0xff] }
  0xb4   : > { %v4915_v28 = vld [vmem:[%s6566_s1 + $0x30] sm:$0xff]   ;;  %v4919_v32 = vld [vmem:[%s6566_s1 + $0x38] sm:$0xff]   ;;  %v3763_v37 = vcombine.low %v387_v34, %v395_v35  ;;  %v3764_v38 = vcombine.high %v387_v34, %v395_v35  ;;  %v4921_v42 = vld [vmem:[%s6566_s1 + $0x140] sm:$0xff]  }
  0xb5   : > { %4079 = vmatpush3.bf16.msra.mxu0 %v4899_v12  ;;  %v4916_v29 = vld [vmem:[%s6566_s1 + $0xb0] sm:$0xff]   ;;  %v4920_v33 = vld [vmem:[%s6566_s1 + $0xb8] sm:$0xff]   ;;  %v4922_v43 = vld [vmem:[%s6566_s1 + $0x100] sm:$0xff]  }
  0xb6   : > { %4143 = vmatpush3.bf16.msra.mxu1 %v4900_v13  ;;  %4080 = vmatprep.subr.bf16.mxu0 %v4901_v14  ;;  %v388_v36 = vld [vmem:[%s5654_s26 + $0x8] sm:$0xff]  ;;  %v4923_v44 = vld [vmem:[%s6566_s1 + $0x1c0] sm:$0xff]   ;;  %v4933_v12 = vld [vmem:[%s6566_s1 + $0x158] sm:$0xff]  }
  0xb7   : > { %4144 = vmatprep.subr.bf16.mxu1 %v4902_v15  ;;  %v396_v39 = vld [vmem:[%s5654_s26 + $0x48] sm:$0xff]  ;;  %2218 = vmatprep.mubr.bf16.mxu0 %v3764_v38  ;;  %v4924_v45 = vld [vmem:[%s6566_s1 + $0x180] sm:$0xff]   ;;  %v4934_v13 = vld [vmem:[%s6566_s1 + $0x118] sm:$0xff]  }
  0xb8   : > { %v3765_v40 = vcombine.low %v388_v36, %v396_v39  ;;  %v3766_v41 = vcombine.high %v388_v36, %v396_v39  ;;  %v403_v46 = vld [vmem:[%s5654_s26 + $0x80] sm:$0xff]  ;;  %v404_v49 = vld [vmem:[%s5654_s26 + $0x88] sm:$0xff]  ;;  %v4935_v14 = vld [vmem:[%s6566_s1 + $0x1d8] sm:$0xff]  }
  0xb9   : > { %4081 = vmatpush3.bf16.msra.mxu0 %v4903_v16  ;;  %v411_v47 = vld [vmem:[%s5654_s26 + $0xc0] sm:$0xff]  ;;  %v412_v50 = vld [vmem:[%s5654_s26 + $0xc8] sm:$0xff]  ;;  %v4936_v15 = vld [vmem:[%s6566_s1 + $0x198] sm:$0xff]  }
  0xba   : > { %4145 = vmatpush3.bf16.msra.mxu1 %v4904_v17  ;;  %4082 = vmatprep.subr.bf16.mxu0 %v4905_v18  ;;  %v3780_v48 = vcombine.high %v403_v46, %v411_v47  ;;  %v3782_v51 = vcombine.high %v404_v49, %v412_v50  ;;  %v4925_v52 = vld [vmem:[%s6566_s1 + $0x148] sm:$0xff]   ;;  %v3779_v53 = vcombine.low %v403_v46, %v411_v47  ;;  %v4929_v0 = vld [vmem:[%s6566_s1 + $0x150] sm:$0xff]   ;;  %vm6450_vm4 = vmpackc.low %vm3025_vm2, %vm3025_vm2 }
  0xbb   : > { %4146 = vmatprep.subr.bf16.mxu1 %v4906_v19  ;;  %2315 = vmatprep.mubr.bf16.mxu1 %v3766_v41  ;;  %v4926_v54 = vld [vmem:[%s6566_s1 + $0x108] sm:$0xff]   ;;  %v3781_v55 = vcombine.low %v404_v49, %v412_v50  ;;  %v4930_v1 = vld [vmem:[%s6566_s1 + $0x110] sm:$0xff]   ;;  %v4950_v50 = vld [vmem:[%s6566_s1 + $0x138] sm:$0xff]  }
  0xbc   : > { %v4927_v56 = vld [vmem:[%s6566_s1 + $0x1c8] sm:$0xff]   ;;  %v4931_v2 = vld [vmem:[%s6566_s1 + $0x1d0] sm:$0xff]  }
  0xbd   : > { %4083 = vmatpush3.bf16.msra.mxu0 %v4907_v20  ;;  %v4928_v57 = vld [vmem:[%s6566_s1 + $0x188] sm:$0xff]   ;;  %v4932_v3 = vld [vmem:[%s6566_s1 + $0x190] sm:$0xff]   ;;  %v4937_v20 = vld [vmem:[%s6566_s1 + $0x160] sm:$0xff]  }
  0xbe   : > { %4147 = vmatpush3.bf16.msra.mxu1 %v4908_v21  ;;  %4084 = vmatprep.subr.bf16.mxu0 %v4909_v22  ;;  %v419_v58 = vld [vmem:[%s5654_s26 + $0x100] sm:$0xff]  ;;  %v420_v60 = vld [vmem:[%s5654_s26 + $0x108] sm:$0xff] }
  0xbf   : > { %4148 = vmatprep.subr.bf16.mxu1 %v4910_v23  ;;  %v427_v59 = vld [vmem:[%s5654_s26 + $0x140] sm:$0xff]  ;;  %v428_v61 = vld [vmem:[%s5654_s26 + $0x148] sm:$0xff] }
  0xc0   : > { %v3796_v62 = vcombine.high %v419_v58, %v427_v59  ;;  %v3798_v63 = vcombine.high %v420_v60, %v428_v61  ;;  %v3795_v4 = vcombine.low %v419_v58, %v427_v59  ;;  %v435_v5 = vld [vmem:[%s5654_s26 + $0x180] sm:$0xff]  ;;  %v436_v7 = vld [vmem:[%s5654_s26 + $0x188] sm:$0xff]  ;;  %v3797_v8 = vcombine.low %v420_v60, %v428_v61 }
  0xc1   : > { %4085 = vmatpush3.bf16.msra.mxu0 %v4911_v24  ;;  %v443_v6 = vld [vmem:[%s5654_s26 + $0x1c0] sm:$0xff]  ;;  %v444_v10 = vld [vmem:[%s5654_s26 + $0x1c8] sm:$0xff] }
  0xc2   : > { %4149 = vmatpush3.bf16.msra.mxu1 %v4912_v25  ;;  %4086 = vmatprep.subr.bf16.mxu0 %v4913_v26  ;;  %v3812_v9 = vcombine.high %v435_v5, %v443_v6  ;;  %v3814_v11 = vcombine.high %v436_v7, %v444_v10  ;;  %v451_v16 = vld [vmem:[%s5654_s26 + $0x200] sm:$0xff]  ;;  %v452_v18 = vld [vmem:[%s5654_s26 + $0x208] sm:$0xff]  ;;  %v3811_v21 = vcombine.low %v435_v5, %v443_v6  ;;  %v398_v5 = vld [vmem:[%s5654_s26 + $0x58] sm:$0xff] }
  0xc3   : > { %4150 = vmatprep.subr.bf16.mxu1 %v4914_v27  ;;  %v459_v17 = vld [vmem:[%s5654_s26 + $0x240] sm:$0xff]  ;;  %v460_v19 = vld [vmem:[%s5654_s26 + $0x248] sm:$0xff]  ;;  %v3813_v23 = vcombine.low %v436_v7, %v444_v10  ;;  %v405_v10 = vld [vmem:[%s5654_s26 + $0x90] sm:$0xff] }
  0xc4   : > { %v4938_v22 = vld [vmem:[%s6566_s1 + $0x120] sm:$0xff]   ;;  %v3828_v24 = vcombine.high %v451_v16, %v459_v17  ;;  %v3830_v26 = vcombine.high %v452_v18, %v460_v19  ;;  %v4943_v34 = vld [vmem:[%s6566_s1 + $0x1e8] sm:$0xff]   ;;  %v3827_v36 = vcombine.low %v451_v16, %v459_v17  ;;  %v4946_v41 = vld [vmem:[%s6566_s1 + $0x130] sm:$0xff]  }
  0xc5   : > { %4087 = vmatpush3.bf16.msra.mxu0 %v4915_v28  ;;  %v4939_v25 = vld [vmem:[%s6566_s1 + $0x1e0] sm:$0xff]   ;;  %v4944_v35 = vld [vmem:[%s6566_s1 + $0x1a8] sm:$0xff]  }
  0xc6   : > { %4151 = vmatpush3.bf16.msra.mxu1 %v4916_v29  ;;  %4088 = vmatprep.subr.bf16.mxu0 %v4917_v30  ;;  %v4940_v27 = vld [vmem:[%s6566_s1 + $0x1a0] sm:$0xff]   ;;  %v4941_v30 = vld [vmem:[%s6566_s1 + $0x168] sm:$0xff]  }
  0xc7   : > { %4152 = vmatprep.subr.bf16.mxu1 %v4918_v31  ;;  %v467_v28 = vld [vmem:[%s5654_s26 + $0x280] sm:$0xff]  ;;  %v468_v31 = vld [vmem:[%s5654_s26 + $0x288] sm:$0xff] }
  0xc8   : > { %v475_v29 = vld [vmem:[%s5654_s26 + $0x2c0] sm:$0xff]  ;;  %v484_v46 = vld [vmem:[%s5654_s26 + $0x308] sm:$0xff] }
  0xc9   : > { %4089 = vmatpush3.bf16.msra.mxu0 %v4919_v32  ;;  %v476_v32 = vld [vmem:[%s5654_s26 + $0x2c8] sm:$0xff]  ;;  %v3844_v38 = vcombine.high %v467_v28, %v475_v29  ;;  %v3843_v49 = vcombine.low %v467_v28, %v475_v29  ;;  %v4953_v58 = vld [vmem:[%s6566_s1 + $0x240] sm:$0xff]  }
  0xca   : > { %4153 = vmatpush3.bf16.msra.mxu1 %v4920_v33  ;;  %4202 = vmatprep.subr.bf16.mxu0 %v4921_v42  ;;  %v4942_v33 = vld [vmem:[%s6566_s1 + $0x128] sm:$0xff]   ;;  %v3846_v39 = vcombine.high %v468_v31, %v476_v32  ;;  %v4947_v42 = vld [vmem:[%s6566_s1 + $0x1f0] sm:$0xff]   ;;  %v4955_v60 = vld [vmem:[%s6566_s1 + $0x2c0] sm:$0xff]  }
  0xcb   : > { %4266 = vmatprep.subr.bf16.mxu1 %v4923_v44  ;;  %v491_v44 = vld [vmem:[%s5654_s26 + $0x340] sm:$0xff]  ;;  %v492_v47 = vld [vmem:[%s5654_s26 + $0x348] sm:$0xff] }
  0xcc   : > { %2219 = vmatmul.mubr.bf16.vlgmr.msra.gmra.mrb[0].mxu0 %v3763_v37  ;;  %v3829_v37 = vcombine.low %v452_v18, %v460_v19  ;;  %v500_v59 = vld [vmem:[%s5654_s26 + $0x388] sm:$0xff]  ;;  %v4956_v17 = vld [vmem:[%s6566_s1 + $0x280] sm:$0xff]  }
  0xcd   : > { %2316 = vmatmul.mubr.bf16.vlgmr.msra.gmra.mrb[0].mxu1 %v3765_v40  ;;  %4203 = vmatpush3.bf16.msra.mxu0 %v4922_v43  ;;  %v4945_v40 = vld [vmem:[%s6566_s1 + $0x170] sm:$0xff]   ;;  %v483_v43 = vld [vmem:[%s5654_s26 + $0x300] sm:$0xff] }
  0xce   : > { %4267 = vmatpush3.bf16.msra.mxu1 %v4924_v45  ;;  %2226 = vmatprep.mubr.bf16.mxu0 %v3780_v48  ;;  %v4948_v45 = vld [vmem:[%s6566_s1 + $0x1b0] sm:$0xff]   ;;  %v4949_v48 = vld [vmem:[%s6566_s1 + $0x178] sm:$0xff]   ;;  %v4957_v19 = vld [vmem:[%s6566_s1 + $0x248] sm:$0xff]  }
  0xcf   : > { %2323 = vmatprep.mubr.bf16.mxu1 %v3782_v51  ;;  %4204 = vmatprep.subr.bf16.mxu0 %v4925_v52  ;;  %v3845_v51 = vcombine.low %v468_v31, %v476_v32  ;;  %v3860_v52 = vcombine.high %v483_v43, %v491_v44  ;;  %v508_v61 = vld [vmem:[%s5654_s26 + $0x3c8] sm:$0xff] }
  0xd0   : > { %4268 = vmatprep.subr.bf16.mxu1 %v4927_v56  ;;  %v499_v56 = vld [vmem:[%s5654_s26 + $0x380] sm:$0xff]  ;;  %v3877_v7 = vcombine.low %v500_v59, %v508_v61  ;;  %v4961_v28 = vld [vmem:[%s6566_s1 + $0x250] sm:$0xff]  }
  0xd1   : > { %4205 = vmatpush3.bf16.msra.mxu0 %v4926_v54  ;;  %v3862_v54 = vcombine.high %v484_v46, %v492_v47  ;;  %v4963_v29 = vld [vmem:[%s6566_s1 + $0x2d0] sm:$0xff]  }
  0xd2   : > { %4269 = vmatpush3.bf16.msra.mxu1 %v4928_v57  ;;  %4206 = vmatprep.subr.bf16.mxu0 %v4929_v0  ;;  %v507_v57 = vld [vmem:[%s5654_s26 + $0x3c0] sm:$0xff] }
  0xd3   : > { %4270 = vmatprep.subr.bf16.mxu1 %v4931_v2  ;;  %v3876_v0 = vcombine.high %v499_v56, %v507_v57  ;;  %v389_v2 = vld [vmem:[%s5654_s26 + $0x10] sm:$0xff]  ;;  %v3875_v6 = vcombine.low %v499_v56, %v507_v57  ;;  %v454_v56 = vld [vmem:[%s5654_s26 + $0x218] sm:$0xff] }
  0xd4   : > { %2227 = vmatmul.mubr.bf16.gmra.mrb[4].mxu0 %v3779_v53  ;;  %v4951_v53 = vld [vmem:[%s6566_s1 + $0x1f8] sm:$0xff]  }
  0xd5   : > { %2324 = vmatmul.mubr.bf16.gmra.mrb[4].mxu1 %v3781_v55  ;;  %2234 = vmatprep.mubr.bf16.mxu0 %v3796_v62  ;;  %v4952_v55 = vld [vmem:[%s6566_s1 + $0x1b8] sm:$0xff]   ;;  %v3859_v62 = vcombine.low %v483_v43, %v491_v44  ;;  %v4969_v44 = vld [vmem:[%s6566_s1 + $0x260] sm:$0xff]  }
  0xd6   : > { %2331 = vmatprep.mubr.bf16.mxu1 %v3798_v63  ;;  %4207 = vmatpush3.bf16.msra.mxu0 %v4930_v1  ;;  %v3861_v63 = vcombine.low %v484_v46, %v492_v47  ;;  %v3878_v1 = vcombine.high %v500_v59, %v508_v61  ;;  %v4968_v43 = vld [vmem:[%s6566_s1 + $0x298] sm:$0xff]   ;;  %v4971_v46 = vld [vmem:[%s6566_s1 + $0x2e0] sm:$0xff]   ;;  %v4976_v59 = vld [vmem:[%s6566_s1 + $0x2a8] sm:$0xff]  }
  0xd7   : > { %4271 = vmatpush3.bf16.msra.mxu1 %v4932_v3  ;;  %4208 = vmatprep.subr.bf16.mxu0 %v4933_v12  ;;  %v397_v3 = vld [vmem:[%s5654_s26 + $0x50] sm:$0xff]  ;;  %v462_v57 = vld [vmem:[%s5654_s26 + $0x258] sm:$0xff] }
  0xd8   : > { %4272 = vmatprep.subr.bf16.mxu1 %v4935_v14  ;;  %v3767_v12 = vcombine.low %v389_v2, %v397_v3  ;;  %v406_v14 = vld [vmem:[%s5654_s26 + $0x98] sm:$0xff] }
  0xda   : > { %4209 = vmatpush3.bf16.msra.mxu0 %v4934_v13  ;;  %v4954_v13 = vld [vmem:[%s6566_s1 + $0x200] sm:$0xff]  }
  0xdb   : > { %4273 = vmatpush3.bf16.msra.mxu1 %v4936_v15  ;;  %4210 = vmatprep.subr.bf16.mxu0 %v4937_v20  ;;  %v414_v15 = vld [vmem:[%s5654_s26 + $0xd8] sm:$0xff] }
  0xdc   : > { %2235 = vmatmul.mubr.bf16.gmra.mrb[8].mxu0 %v3795_v4  ;;  %4274 = vmatprep.subr.bf16.mxu1 %v4939_v25  ;;  %v390_v4 = vld [vmem:[%s5654_s26 + $0x18] sm:$0xff]  ;;  %v3786_v20 = vcombine.high %v406_v14, %v414_v15  ;;  %v429_v25 = vld [vmem:[%s5654_s26 + $0x150] sm:$0xff]  ;;  %v3785_v31 = vcombine.low %v406_v14, %v414_v15  ;;  %v3833_v15 = vcombine.low %v454_v56, %v462_v57 }
  0xdd   : > { %2332 = vmatmul.mubr.bf16.gmra.mrb[8].mxu1 %v3797_v8  ;;  %2242 = vmatprep.mubr.bf16.mxu0 %v3812_v9  ;;  %v3768_v8 = vcombine.high %v389_v2, %v397_v3  ;;  %v3770_v9 = vcombine.high %v390_v4, %v398_v5  ;;  %v3769_v16 = vcombine.low %v390_v4, %v398_v5  ;;  %v4978_v2 = vld [vmem:[%s6566_s1 + $0x230] sm:$0xff]   ;;  %v4981_v4 = vld [vmem:[%s6566_s1 + $0x278] sm:$0xff]   ;;  %v4987_v14 = vld [vmem:[%s6566_s1 + $0x3c0] sm:$0xff]  }
  0xde   : > { %2339 = vmatprep.mubr.bf16.mxu1 %v3814_v11  ;;  %4211 = vmatpush3.bf16.msra.mxu0 %v4938_v22  ;;  %v413_v11 = vld [vmem:[%s5654_s26 + $0xd0] sm:$0xff]  ;;  %v4959_v22 = vld [vmem:[%s6566_s1 + $0x2c8] sm:$0xff]  }
  0xdf   : > { %4275 = vmatpush3.bf16.msra.mxu1 %v4940_v27  ;;  %4212 = vmatprep.subr.bf16.mxu0 %v4941_v30  ;;  %v3784_v18 = vcombine.high %v405_v10, %v413_v11  ;;  %v430_v27 = vld [vmem:[%s5654_s26 + $0x158] sm:$0xff]  ;;  %v3783_v30 = vcombine.low %v405_v10, %v413_v11  ;;  %v4980_v3 = vld [vmem:[%s6566_s1 + $0x2b0] sm:$0xff]  }
  0xe0   : > { %4276 = vmatprep.subr.bf16.mxu1 %v4943_v34  ;;  %v4962_v34 = vld [vmem:[%s6566_s1 + $0x210] sm:$0xff]   ;;  %v4982_v10 = vld [vmem:[%s6566_s1 + $0x238] sm:$0xff]  }
  0xe1   : > { %v469_v5 = vld [vmem:[%s5654_s26 + $0x290] sm:$0xff] }
  0xe2   : > { %4213 = vmatpush3.bf16.msra.mxu0 %v4942_v33  ;;  %v4984_v11 = vld [vmem:[%s6566_s1 + $0x2b8] sm:$0xff]  }
  0xe3   : > { %4277 = vmatpush3.bf16.msra.mxu1 %v4944_v35  ;;  %4214 = vmatprep.subr.bf16.mxu0 %v4945_v40  ;;  %v4964_v35 = vld [vmem:[%s6566_s1 + $0x290] sm:$0xff]   ;;  %v438_v40 = vld [vmem:[%s5654_s26 + $0x198] sm:$0xff] }
  0xe4   : > { %2243 = vmatmul.mubr.bf16.gmra.mrb[12].mxu0 %v3811_v21  ;;  %4278 = vmatprep.subr.bf16.mxu1 %v4947_v42  ;;  %v4958_v21 = vld [vmem:[%s6566_s1 + $0x208] sm:$0xff]   ;;  %v4966_v42 = vld [vmem:[%s6566_s1 + $0x218] sm:$0xff]  }
  0xe5   : > { %2340 = vmatmul.mubr.bf16.gmra.mrb[12].mxu1 %v3813_v23  ;;  %2250 = vmatprep.mubr.bf16.mxu0 %v3828_v24  ;;  %v4960_v23 = vld [vmem:[%s6566_s1 + $0x288] sm:$0xff]   ;;  %v421_v24 = vld [vmem:[%s5654_s26 + $0x110] sm:$0xff] }
  0xe6   : > { %2347 = vmatprep.mubr.bf16.mxu1 %v3830_v26  ;;  %4215 = vmatpush3.bf16.msra.mxu0 %v4946_v41  ;;  %v422_v26 = vld [vmem:[%s5654_s26 + $0x118] sm:$0xff]  ;;  %v3800_v32 = vcombine.high %v421_v24, %v429_v25 }
  0xe7   : > { %4279 = vmatpush3.bf16.msra.mxu1 %v4948_v45  ;;  %4216 = vmatprep.subr.bf16.mxu0 %v4949_v48  ;;  %v3802_v33 = vcombine.high %v422_v26, %v430_v27  ;;  %v446_v41 = vld [vmem:[%s5654_s26 + $0x1d8] sm:$0xff]  ;;  %v3799_v45 = vcombine.low %v421_v24, %v429_v25  ;;  %v3801_v47 = vcombine.low %v422_v26, %v430_v27  ;;  %v501_v26 = vld [vmem:[%s5654_s26 + $0x390] sm:$0xff] }
  0xe8   : > { %4280 = vmatprep.subr.bf16.mxu1 %v4951_v53  ;;  %v453_v53 = vld [vmem:[%s5654_s26 + $0x210] sm:$0xff] }
  0xe9   : > { %v509_v27 = vld [vmem:[%s5654_s26 + $0x3d0] sm:$0xff] }
  0xea   : > { %4217 = vmatpush3.bf16.msra.mxu0 %v4950_v50  ;;  %v3818_v50 = vcombine.high %v438_v40, %v446_v41 }
  0xeb   : > { %4281 = vmatpush3.bf16.msra.mxu1 %v4952_v55  ;;  %4330 = vmatprep.subr.bf16.mxu0 %v4953_v58  ;;  %v461_v55 = vld [vmem:[%s5654_s26 + $0x250] sm:$0xff]  ;;  %v4974_v58 = vld [vmem:[%s6566_s1 + $0x228] sm:$0xff]  }
  0xec   : > { %2251 = vmatmul.mubr.bf16.gmra.mrb[16].mxu0 %v3827_v36  ;;  %4394 = vmatprep.subr.bf16.mxu1 %v4955_v60  ;;  %v4965_v36 = vld [vmem:[%s6566_s1 + $0x258] sm:$0xff]   ;;  %v4977_v60 = vld [vmem:[%s6566_s1 + $0x270] sm:$0xff]  }
  0xed   : > { %2348 = vmatmul.mubr.bf16.gmra.mrb[16].mxu1 %v3829_v37  ;;  %2258 = vmatprep.mubr.bf16.mxu0 %v3844_v38  ;;  %v437_v37 = vld [vmem:[%s5654_s26 + $0x190] sm:$0xff] }
  0xee   : > { %2355 = vmatprep.mubr.bf16.mxu1 %v3846_v39  ;;  %v445_v38 = vld [vmem:[%s5654_s26 + $0x1d0] sm:$0xff] }
  0xef   : > { %v4967_v39 = vld [vmem:[%s6566_s1 + $0x2d8] sm:$0xff]   ;;  %v3816_v48 = vcombine.high %v437_v37, %v445_v38  ;;  %v3815_v61 = vcombine.low %v437_v37, %v445_v38  ;;  %v400_v37 = vld [vmem:[%s5654_s26 + $0x68] sm:$0xff]  ;;  %v3879_v38 = vcombine.low %v501_v26, %v509_v27 }
  0xf4   : > { %2259 = vmatmul.mubr.bf16.gmra.mrb[20].mxu0 %v3843_v49  ;;  %v4970_v49 = vld [vmem:[%s6566_s1 + $0x220] sm:$0xff]  }
  0xf5   : > { %2356 = vmatmul.mubr.bf16.gmra.mrb[20].mxu1 %v3845_v51  ;;  %2266 = vmatprep.mubr.bf16.mxu0 %v3860_v52  ;;  %v4972_v51 = vld [vmem:[%s6566_s1 + $0x2a0] sm:$0xff]   ;;  %v4973_v52 = vld [vmem:[%s6566_s1 + $0x268] sm:$0xff]  }
  0xf6   : > { %2363 = vmatprep.mubr.bf16.mxu1 %v3862_v54  ;;  %v4975_v54 = vld [vmem:[%s6566_s1 + $0x2e8] sm:$0xff]  }
  0xfc   : > { %2267 = vmatmul.mubr.bf16.gmra.mrb[24].mxu0 %v3859_v62  ;;  %v4979_v62 = vld [vmem:[%s6566_s1 + $0x2f0] sm:$0xff]  }
  0xfd   : > { %2364 = vmatmul.mubr.bf16.gmra.mrb[24].mxu1 %v3861_v63  ;;  %2274 = vmatprep.mubr.bf16.mxu0 %v3876_v0  ;;  %v3817_v63 = vcombine.low %v438_v40, %v446_v41  ;;  %v3832_v0 = vcombine.high %v453_v53, %v461_v55 }
  0xfe   : > { %2371 = vmatprep.mubr.bf16.mxu1 %v3878_v1  ;;  %v3834_v1 = vcombine.high %v454_v56, %v462_v57  ;;  %v423_v56 = vld [vmem:[%s5654_s26 + $0x120] sm:$0xff] }
  0xff   : > { %v431_v57 = vld [vmem:[%s5654_s26 + $0x160] sm:$0xff] }
 0x104   : > { %2275 = vmatmul.mubr.bf16.gmra.mrb[28].mxu0 %v3875_v6  ;;  %v477_v6 = vld [vmem:[%s5654_s26 + $0x2d0] sm:$0xff] }
 0x105   : > { %2372 = vmatmul.mubr.bf16.gmra.mrb[28].mxu1 %v3877_v7  ;;  %2412 = vmatprep.mubr.bf16.mxu0 %v3768_v8  ;;  %v4983_v7 = vld [vmem:[%s6566_s1 + $0x2f8] sm:$0xff]  }
 0x106   : > { %2509 = vmatprep.mubr.bf16.mxu1 %v3770_v9  ;;  %v470_v8 = vld [vmem:[%s5654_s26 + $0x298] sm:$0xff] }
 0x107   : > { %v478_v9 = vld [vmem:[%s5654_s26 + $0x2d8] sm:$0xff] }
 0x10c   : > { %2413 = vmatmul.mubr.bf16.vlgmr.msra.gmra.mrb[32].mxu0 %v3767_v12  ;;  %v4985_v12 = vld [vmem:[%s6566_s1 + $0x340] sm:$0xff]  }
 0x10d   : > { %2510 = vmatmul.mubr.bf16.vlgmr.msra.gmra.mrb[32].mxu1 %v3769_v16  ;;  %4331 = vmatpush3.bf16.msra.mxu0 %v4954_v13  ;;  %v3831_v13 = vcombine.low %v453_v53, %v461_v55  ;;  %v3848_v16 = vcombine.high %v469_v5, %v477_v6  ;;  %v4991_v53 = vld [vmem:[%s6566_s1 + $0x3c8] sm:$0xff]  }
 0x10e   : > { %4395 = vmatpush3.bf16.msra.mxu1 %v4956_v17  ;;  %2420 = vmatprep.mubr.bf16.mxu0 %v3784_v18  ;;  %v3850_v17 = vcombine.high %v470_v8, %v478_v9  ;;  %v485_v18 = vld [vmem:[%s5654_s26 + $0x310] sm:$0xff]  ;;  %v4992_v55 = vld [vmem:[%s6566_s1 + $0x388] sm:$0xff]  }
 0x10f   : > { %2517 = vmatprep.mubr.bf16.mxu1 %v3786_v20  ;;  %4332 = vmatprep.subr.bf16.mxu0 %v4957_v19  ;;  %v493_v19 = vld [vmem:[%s5654_s26 + $0x350] sm:$0xff]  ;;  %v486_v20 = vld [vmem:[%s5654_s26 + $0x318] sm:$0xff] }
 0x110   : > { %4396 = vmatprep.subr.bf16.mxu1 %v4959_v22  ;;  %v3847_v22 = vcombine.low %v469_v5, %v477_v6  ;;  %v3864_v24 = vcombine.high %v485_v18, %v493_v19  ;;  %v4999_v5 = vld [vmem:[%s6566_s1 + $0x3d8] sm:$0xff]   ;;  %v439_v6 = vld [vmem:[%s5654_s26 + $0x1a0] sm:$0xff] }
 0x111   : > { %4333 = vmatpush3.bf16.msra.mxu0 %v4958_v21  ;;  %v494_v21 = vld [vmem:[%s5654_s26 + $0x358] sm:$0xff] }
 0x112   : > { %4397 = vmatpush3.bf16.msra.mxu1 %v4960_v23  ;;  %4334 = vmatprep.subr.bf16.mxu0 %v4961_v28  ;;  %v3849_v23 = vcombine.low %v470_v8, %v478_v9  ;;  %v3866_v25 = vcombine.high %v486_v20, %v494_v21  ;;  %v502_v28 = vld [vmem:[%s5654_s26 + $0x398] sm:$0xff]  ;;  %v440_v8 = vld [vmem:[%s5654_s26 + $0x1a8] sm:$0xff] }
 0x113   : > { %4398 = vmatprep.subr.bf16.mxu1 %v4963_v29  ;;  %v510_v29 = vld [vmem:[%s5654_s26 + $0x3d8] sm:$0xff] }
 0x114   : > { %2421 = vmatmul.mubr.bf16.gmra.mrb[36].mxu0 %v3783_v30  ;;  %v3863_v30 = vcombine.low %v485_v18, %v493_v19  ;;  %v4998_v9 = vld [vmem:[%s6566_s1 + $0x318] sm:$0xff]   ;;  %v5002_v18 = vld [vmem:[%s6566_s1 + $0x320] sm:$0xff]  }
 0x115   : > { %2518 = vmatmul.mubr.bf16.gmra.mrb[36].mxu1 %v3785_v31  ;;  %2428 = vmatprep.mubr.bf16.mxu0 %v3800_v32  ;;  %v3865_v31 = vcombine.low %v486_v20, %v494_v21  ;;  %v3880_v32 = vcombine.high %v501_v26, %v509_v27  ;;  %v5004_v19 = vld [vmem:[%s6566_s1 + $0x3a0] sm:$0xff]   ;;  %v5005_v20 = vld [vmem:[%s6566_s1 + $0x368] sm:$0xff]  }
 0x116   : > { %2525 = vmatprep.mubr.bf16.mxu1 %v3802_v33  ;;  %4335 = vmatpush3.bf16.msra.mxu0 %v4962_v34  ;;  %v3882_v33 = vcombine.high %v502_v28, %v510_v29  ;;  %v391_v34 = vld [vmem:[%s5654_s26 + $0x20] sm:$0xff]  ;;  %v464_v26 = vld [vmem:[%s5654_s26 + $0x268] sm:$0xff] }
 0x117   : > { %4399 = vmatpush3.bf16.msra.mxu1 %v4964_v35  ;;  %4336 = vmatprep.subr.bf16.mxu0 %v4965_v36  ;;  %v399_v35 = vld [vmem:[%s5654_s26 + $0x60] sm:$0xff]  ;;  %v392_v36 = vld [vmem:[%s5654_s26 + $0x28] sm:$0xff] }
 0x118   : > { %4400 = vmatprep.subr.bf16.mxu1 %v4967_v39  ;;  %v3881_v39 = vcombine.low %v502_v28, %v510_v29  ;;  %v3772_v40 = vcombine.high %v391_v34, %v399_v35  ;;  %v3774_v41 = vcombine.high %v392_v36, %v400_v37  ;;  %v5007_v21 = vld [vmem:[%s6566_s1 + $0x3e8] sm:$0xff]   ;;  %v5009_v28 = vld [vmem:[%s6566_s1 + $0x370] sm:$0xff]  }
 0x119   : > { %v5008_v27 = vld [vmem:[%s6566_s1 + $0x3a8] sm:$0xff]  }
 0x11a   : > { %4337 = vmatpush3.bf16.msra.mxu0 %v4966_v42  ;;  %v407_v42 = vld [vmem:[%s5654_s26 + $0xa0] sm:$0xff] }
 0x11b   : > { %4401 = vmatpush3.bf16.msra.mxu1 %v4968_v43  ;;  %4338 = vmatprep.subr.bf16.mxu0 %v4969_v44  ;;  %v415_v43 = vld [vmem:[%s5654_s26 + $0xe0] sm:$0xff]  ;;  %v3771_v44 = vcombine.low %v391_v34, %v399_v35  ;;  %v5010_v34 = vld [vmem:[%s6566_s1 + $0x330] sm:$0xff]  }
 0x11c   : > { %2429 = vmatmul.mubr.bf16.gmra.mrb[40].mxu0 %v3799_v45  ;;  %4402 = vmatprep.subr.bf16.mxu1 %v4971_v46  ;;  %v408_v45 = vld [vmem:[%s5654_s26 + $0xa8] sm:$0xff] }
 0x11d   : > { %2526 = vmatmul.mubr.bf16.gmra.mrb[40].mxu1 %v3801_v47  ;;  %2436 = vmatprep.mubr.bf16.mxu0 %v3816_v48  ;;  %v416_v46 = vld [vmem:[%s5654_s26 + $0xe8] sm:$0xff]  ;;  %v3773_v47 = vcombine.low %v392_v36, %v400_v37  ;;  %v4986_v48 = vld [vmem:[%s6566_s1 + $0x300] sm:$0xff]   ;;  %v5013_v36 = vld [vmem:[%s6566_s1 + $0x378] sm:$0xff]  }
 0x11e   : > { %2533 = vmatprep.mubr.bf16.mxu1 %v3818_v50  ;;  %4339 = vmatpush3.bf16.msra.mxu0 %v4970_v49  ;;  %v4988_v49 = vld [vmem:[%s6566_s1 + $0x380] sm:$0xff]   ;;  %v3788_v50 = vcombine.high %v407_v42, %v415_v43  ;;  %v5012_v35 = vld [vmem:[%s6566_s1 + $0x3b0] sm:$0xff]   ;;  %v5015_v37 = vld [vmem:[%s6566_s1 + $0x3f8] sm:$0xff]  }
 0x11f   : > { %4403 = vmatpush3.bf16.msra.mxu1 %v4972_v51  ;;  %4340 = vmatprep.subr.bf16.mxu0 %v4973_v52  ;;  %v3790_v51 = vcombine.high %v408_v45, %v416_v46  ;;  %v4989_v52 = vld [vmem:[%s6566_s1 + $0x348] sm:$0xff]  }
 0x120   : > { %4404 = vmatprep.subr.bf16.mxu1 %v4975_v54  ;;  %v4990_v54 = vld [vmem:[%s6566_s1 + $0x308] sm:$0xff]  }
 0x122   : > { %4341 = vmatpush3.bf16.msra.mxu0 %v4974_v58  ;;  %v4993_v58 = vld [vmem:[%s6566_s1 + $0x350] sm:$0xff]  }
 0x123   : > { %4405 = vmatpush3.bf16.msra.mxu1 %v4976_v59  ;;  %4342 = vmatprep.subr.bf16.mxu0 %v4977_v60  ;;  %v424_v59 = vld [vmem:[%s5654_s26 + $0x128] sm:$0xff] }
 0x124   : > { %2437 = vmatmul.mubr.bf16.gmra.mrb[44].mxu0 %v3815_v61  ;;  %4406 = vmatprep.subr.bf16.mxu1 %v4979_v62  ;;  %v432_v60 = vld [vmem:[%s5654_s26 + $0x168] sm:$0xff]  ;;  %v3787_v62 = vcombine.low %v407_v42, %v415_v43  ;;  %v5016_v43 = vld [vmem:[%s6566_s1 + $0x3b8] sm:$0xff]  }
 0x125   : > { %2534 = vmatmul.mubr.bf16.gmra.mrb[44].mxu1 %v3817_v63  ;;  %2444 = vmatprep.mubr.bf16.mxu0 %v3832_v0  ;;  %v4995_v61 = vld [vmem:[%s6566_s1 + $0x3d0] sm:$0xff]   ;;  %v3789_v63 = vcombine.low %v408_v45, %v416_v46  ;;  %v3804_v0 = vcombine.high %v423_v56, %v431_v57 }
 0x126   : > { %2541 = vmatprep.mubr.bf16.mxu1 %v3834_v1  ;;  %4343 = vmatpush3.bf16.msra.mxu0 %v4978_v2  ;;  %v4994_v1 = vld [vmem:[%s6566_s1 + $0x310] sm:$0xff]   ;;  %v3806_v2 = vcombine.high %v424_v59, %v432_v60 }
 0x127   : > { %4407 = vmatpush3.bf16.msra.mxu1 %v4980_v3  ;;  %4344 = vmatprep.subr.bf16.mxu0 %v4981_v4  ;;  %v4996_v3 = vld [vmem:[%s6566_s1 + $0x390] sm:$0xff]   ;;  %v4997_v4 = vld [vmem:[%s6566_s1 + $0x358] sm:$0xff]  }
 0x128   : > { %4408 = vmatprep.subr.bf16.mxu1 %v4983_v7  ;;  %v447_v7 = vld [vmem:[%s5654_s26 + $0x1e0] sm:$0xff]  ;;  %v480_v42 = vld [vmem:[%s5654_s26 + $0x2e8] sm:$0xff] }
 0x129   : > { %v3819_v29 = vcombine.low %v439_v6, %v447_v7 }
 0x12a   : > { %4345 = vmatpush3.bf16.msra.mxu0 %v4982_v10  ;;  %v448_v10 = vld [vmem:[%s5654_s26 + $0x1e8] sm:$0xff] }
 0x12b   : > { %4409 = vmatpush3.bf16.msra.mxu1 %v4984_v11  ;;  %4458 = vmatprep.subr.bf16.mxu0 %v4985_v12  ;;  %v5000_v11 = vld [vmem:[%s6566_s1 + $0x398] sm:$0xff]   ;;  %v5001_v12 = vld [vmem:[%s6566_s1 + $0x360] sm:$0xff]  }
 0x12c   : > { %2445 = vmatmul.mubr.bf16.gmra.mrb[48].mxu0 %v3831_v13  ;;  %4522 = vmatprep.subr.bf16.mxu1 %v4987_v14  ;;  %v3803_v13 = vcombine.low %v423_v56, %v431_v57  ;;  %v5003_v14 = vld [vmem:[%s6566_s1 + $0x3e0] sm:$0xff]  }
 0x12d   : > { %2542 = vmatmul.mubr.bf16.gmra.mrb[48].mxu1 %v3833_v15  ;;  %2452 = vmatprep.mubr.bf16.mxu0 %v3848_v16  ;;  %v3805_v15 = vcombine.low %v424_v59, %v432_v60  ;;  %v3820_v16 = vcombine.high %v439_v6, %v447_v7  ;;  %v503_v56 = vld [vmem:[%s5654_s26 + $0x3a0] sm:$0xff]  ;;  %v512_v59 = vld [vmem:[%s5654_s26 + $0x3e8] sm:$0xff] }
 0x12e   : > { %2549 = vmatprep.mubr.bf16.mxu1 %v3850_v17  ;;  %v3822_v17 = vcombine.high %v440_v8, %v448_v10  ;;  %v511_v57 = vld [vmem:[%s5654_s26 + $0x3e0] sm:$0xff] }
 0x134   : > { %2453 = vmatmul.mubr.bf16.gmra.mrb[52].mxu0 %v3847_v22  ;;  %v455_v22 = vld [vmem:[%s5654_s26 + $0x220] sm:$0xff] }
 0x135   : > { %2550 = vmatmul.mubr.bf16.gmra.mrb[52].mxu1 %v3849_v23  ;;  %2460 = vmatprep.mubr.bf16.mxu0 %v3864_v24  ;;  %v463_v23 = vld [vmem:[%s5654_s26 + $0x260] sm:$0xff]  ;;  %v456_v24 = vld [vmem:[%s5654_s26 + $0x228] sm:$0xff] }
 0x136   : > { %2557 = vmatprep.mubr.bf16.mxu1 %v3866_v25  ;;  %v5006_v25 = vld [vmem:[%s6566_s1 + $0x328] sm:$0xff]   ;;  %v3837_v45 = vcombine.low %v456_v24, %v464_v26 }
 0x13c   : > { %2461 = vmatmul.mubr.bf16.gmra.mrb[56].mxu0 %v3863_v30  ;;  %v5011_v30 = vld [vmem:[%s6566_s1 + $0x3f0] sm:$0xff]  }
 0x13d   : > { %2558 = vmatmul.mubr.bf16.gmra.mrb[56].mxu1 %v3865_v31  ;;  %2468 = vmatprep.mubr.bf16.mxu0 %v3880_v32  ;;  %v3821_v31 = vcombine.low %v440_v8, %v448_v10  ;;  %v3836_v32 = vcombine.high %v455_v22, %v463_v23  ;;  %v409_v8 = vld [vmem:[%s5654_s26 + $0xb0] sm:$0xff]  ;;  %v410_v10 = vld [vmem:[%s5654_s26 + $0xb8] sm:$0xff] }
 0x13e   : > { %2565 = vmatprep.mubr.bf16.mxu1 %v3882_v33  ;;  %v3838_v33 = vcombine.high %v456_v24, %v464_v26  ;;  %v441_v24 = vld [vmem:[%s5654_s26 + $0x1b0] sm:$0xff]  ;;  %v442_v26 = vld [vmem:[%s5654_s26 + $0x1b8] sm:$0xff] }
 0x144   : > { %2469 = vmatmul.mubr.bf16.gmra.mrb[60].mxu0 %v3879_v38  ;;  %v471_v38 = vld [vmem:[%s5654_s26 + $0x2a0] sm:$0xff] }
 0x145   : > { %2566 = vmatmul.mubr.bf16.gmra.mrb[60].mxu1 %v3881_v39  ;;  %2606 = vmatprep.mubr.bf16.mxu0 %v3772_v40  ;;  %v479_v39 = vld [vmem:[%s5654_s26 + $0x2e0] sm:$0xff]  ;;  %v5014_v40 = vld [vmem:[%s6566_s1 + $0x338] sm:$0xff]  }
 0x146   : > { %2703 = vmatprep.mubr.bf16.mxu1 %v3774_v41  ;;  %v472_v41 = vld [vmem:[%s5654_s26 + $0x2a8] sm:$0xff]  ;;  %v3852_v46 = vcombine.high %v471_v38, %v479_v39 }
 0x14c   : > { %2607 = vmatmul.mubr.bf16.vlgmr.msra.gmra.mrb[64].mxu0 %v3771_v44  ;;  %v3835_v44 = vcombine.low %v455_v22, %v463_v23 }
 0x14d   : > { %2704 = vmatmul.mubr.bf16.vlgmr.msra.gmra.mrb[64].mxu1 %v3773_v47  ;;  %4459 = vmatpush3.bf16.msra.mxu0 %v4986_v48  ;;  %v3854_v47 = vcombine.high %v472_v41, %v480_v42  ;;  %v487_v48 = vld [vmem:[%s5654_s26 + $0x320] sm:$0xff] }
 0x14e   : > { %4523 = vmatpush3.bf16.msra.mxu1 %v4988_v49  ;;  %2614 = vmatprep.mubr.bf16.mxu0 %v3788_v50  ;;  %v495_v49 = vld [vmem:[%s5654_s26 + $0x360] sm:$0xff]  ;;  %v488_v50 = vld [vmem:[%s5654_s26 + $0x328] sm:$0xff] }
 0x14f   : > { %2711 = vmatprep.mubr.bf16.mxu1 %v3790_v51  ;;  %4460 = vmatprep.subr.bf16.mxu0 %v4989_v52  ;;  %v496_v51 = vld [vmem:[%s5654_s26 + $0x368] sm:$0xff]  ;;  %v3851_v52 = vcombine.low %v471_v38, %v479_v39  ;;  %v3867_v60 = vcombine.low %v487_v48, %v495_v49  ;;  %v6171_v38 = vld [vmem:[#allocation9] ss:$0 sm:$0xff] }
 0x150   : > { %4524 = vmatprep.subr.bf16.mxu1 %v4991_v53  ;;  %v3853_v53 = vcombine.low %v472_v41, %v480_v42 }
 0x151   : > { %4461 = vmatpush3.bf16.msra.mxu0 %v4990_v54  ;;  %v3868_v54 = vcombine.high %v487_v48, %v495_v49 }
 0x152   : > { %4525 = vmatpush3.bf16.msra.mxu1 %v4992_v55  ;;  %4462 = vmatprep.subr.bf16.mxu0 %v4993_v58  ;;  %v3870_v55 = vcombine.high %v488_v50, %v496_v51  ;;  %v504_v58 = vld [vmem:[%s5654_s26 + $0x3a8] sm:$0xff] }
 0x153   : > { %4526 = vmatprep.subr.bf16.mxu1 %v4995_v61  ;;  %v3869_v61 = vcombine.low %v488_v50, %v496_v51 }
 0x154   : > { %2615 = vmatmul.mubr.bf16.gmra.mrb[68].mxu0 %v3787_v62  ;;  %v3884_v62 = vcombine.high %v503_v56, %v511_v57 }
 0x155   : > { %2712 = vmatmul.mubr.bf16.gmra.mrb[68].mxu1 %v3789_v63  ;;  %2622 = vmatprep.mubr.bf16.mxu0 %v3804_v0  ;;  %v3886_v63 = vcombine.high %v504_v58, %v512_v59  ;;  %v393_v0 = vld [vmem:[%s5654_s26 + $0x30] sm:$0xff] }
 0x156   : > { %2719 = vmatprep.mubr.bf16.mxu1 %v3806_v2  ;;  %4463 = vmatpush3.bf16.msra.mxu0 %v4994_v1  ;;  %v401_v1 = vld [vmem:[%s5654_s26 + $0x70] sm:$0xff]  ;;  %v394_v2 = vld [vmem:[%s5654_s26 + $0x38] sm:$0xff] }
 0x157   : > { %4527 = vmatpush3.bf16.msra.mxu1 %v4996_v3  ;;  %4464 = vmatprep.subr.bf16.mxu0 %v4997_v4  ;;  %v402_v3 = vld [vmem:[%s5654_s26 + $0x78] sm:$0xff]  ;;  %v3883_v4 = vcombine.low %v503_v56, %v511_v57  ;;  %v3776_v6 = vcombine.high %v393_v0, %v401_v1  ;;  %v473_v56 = vld [vmem:[%s5654_s26 + $0x2b0] sm:$0xff] }
 0x158   : > { %4528 = vmatprep.subr.bf16.mxu1 %v4999_v5  ;;  %v3885_v5 = vcombine.low %v504_v58, %v512_v59  ;;  %v3778_v7 = vcombine.high %v394_v2, %v402_v3  ;;  %v481_v57 = vld [vmem:[%s5654_s26 + $0x2f0] sm:$0xff] }
 0x15a   : > { %4465 = vmatpush3.bf16.msra.mxu0 %v4998_v9  ;;  %v417_v9 = vld [vmem:[%s5654_s26 + $0xf0] sm:$0xff] }
 0x15b   : > { %4529 = vmatpush3.bf16.msra.mxu1 %v5000_v11  ;;  %4466 = vmatprep.subr.bf16.mxu0 %v5001_v12  ;;  %v418_v11 = vld [vmem:[%s5654_s26 + $0xf8] sm:$0xff]  ;;  %v3775_v12 = vcombine.low %v393_v0, %v401_v1 }
 0x15c   : > { %2623 = vmatmul.mubr.bf16.gmra.mrb[72].mxu0 %v3803_v13  ;;  %4530 = vmatprep.subr.bf16.mxu1 %v5003_v14  ;;  %v3777_v13 = vcombine.low %v394_v2, %v402_v3  ;;  %v3792_v14 = vcombine.high %v409_v8, %v417_v9 }
 0x15d   : > { %2720 = vmatmul.mubr.bf16.gmra.mrb[72].mxu1 %v3805_v15  ;;  %2630 = vmatprep.mubr.bf16.mxu0 %v3820_v16  ;;  %v3794_v15 = vcombine.high %v410_v10, %v418_v11  ;;  %v425_v16 = vld [vmem:[%s5654_s26 + $0x130] sm:$0xff] }
 0x15e   : > { %2727 = vmatprep.mubr.bf16.mxu1 %v3822_v17  ;;  %4467 = vmatpush3.bf16.msra.mxu0 %v5002_v18  ;;  %v433_v17 = vld [vmem:[%s5654_s26 + $0x170] sm:$0xff]  ;;  %v426_v18 = vld [vmem:[%s5654_s26 + $0x138] sm:$0xff] }
 0x15f   : > { %4531 = vmatpush3.bf16.msra.mxu1 %v5004_v19  ;;  %4468 = vmatprep.subr.bf16.mxu0 %v5005_v20  ;;  %v434_v19 = vld [vmem:[%s5654_s26 + $0x178] sm:$0xff]  ;;  %v3791_v20 = vcombine.low %v409_v8, %v417_v9  ;;  %v3808_v22 = vcombine.high %v425_v16, %v433_v17 }
 0x160   : > { %4532 = vmatprep.subr.bf16.mxu1 %v5007_v21  ;;  %v3793_v21 = vcombine.low %v410_v10, %v418_v11  ;;  %v3810_v23 = vcombine.high %v426_v18, %v434_v19 }
 0x162   : > { %4469 = vmatpush3.bf16.msra.mxu0 %v5006_v25  ;;  %v449_v25 = vld [vmem:[%s5654_s26 + $0x1f0] sm:$0xff] }
 0x163   : > { %4533 = vmatpush3.bf16.msra.mxu1 %v5008_v27  ;;  %4470 = vmatprep.subr.bf16.mxu0 %v5009_v28  ;;  %v450_v27 = vld [vmem:[%s5654_s26 + $0x1f8] sm:$0xff]  ;;  %v3807_v28 = vcombine.low %v425_v16, %v433_v17  ;;  %v489_v16 = vld [vmem:[%s5654_s26 + $0x330] sm:$0xff] }
 0x164   : > { %2631 = vmatmul.mubr.bf16.gmra.mrb[76].mxu0 %v3819_v29  ;;  %4534 = vmatprep.subr.bf16.mxu1 %v5011_v30  ;;  %v3809_v29 = vcombine.low %v426_v18, %v434_v19  ;;  %v3824_v30 = vcombine.high %v441_v24, %v449_v25  ;;  %v497_v17 = vld [vmem:[%s5654_s26 + $0x370] sm:$0xff] }
 0x165   : > { %2728 = vmatmul.mubr.bf16.gmra.mrb[76].mxu1 %v3821_v31  ;;  %2638 = vmatprep.mubr.bf16.mxu0 %v3836_v32  ;;  %v3826_v31 = vcombine.high %v442_v26, %v450_v27  ;;  %v457_v32 = vld [vmem:[%s5654_s26 + $0x230] sm:$0xff] }
 0x166   : > { %2735 = vmatprep.mubr.bf16.mxu1 %v3838_v33  ;;  %4471 = vmatpush3.bf16.msra.mxu0 %v5010_v34  ;;  %v465_v33 = vld [vmem:[%s5654_s26 + $0x270] sm:$0xff] }
 0x167   : > { %4535 = vmatpush3.bf16.msra.mxu1 %v5012_v35  ;;  %4472 = vmatprep.subr.bf16.mxu0 %v5013_v36  ;;  %v458_v35 = vld [vmem:[%s5654_s26 + $0x238] sm:$0xff]  ;;  %v3839_v0 = vcombine.low %v457_v32, %v465_v33 }
 0x168   : > { %4536 = vmatprep.subr.bf16.mxu1 %v5015_v37  ;;  %v466_v36 = vld [vmem:[%s5654_s26 + $0x278] sm:$0xff] }
 0x169   : > { %v3842_v49 = vcombine.high %v458_v35, %v466_v36 }
 0x16a   : > { %4473 = vmatpush3.bf16.msra.mxu0 %v5014_v40  ;;  %v3823_v40 = vcombine.low %v441_v24, %v449_v25  ;;  %v3855_v24 = vcombine.low %v473_v56, %v481_v57 }
 0x16b   : > { %4537 = vmatpush3.bf16.msra.mxu1 %v5016_v43 }
 0x16c   : > { %2639 = vmatmul.mubr.bf16.gmra.mrb[80].mxu0 %v3835_v44  ;;  %v3825_v44 = vcombine.low %v442_v26, %v450_v27 }
 0x16d   : > { %2736 = vmatmul.mubr.bf16.gmra.mrb[80].mxu1 %v3837_v45  ;;  %2646 = vmatprep.mubr.bf16.mxu0 %v3852_v46  ;;  %v3840_v45 = vcombine.high %v457_v32, %v465_v33 }
 0x16e   : > { %2743 = vmatprep.mubr.bf16.mxu1 %v3854_v47 }
 0x174   : > { %2647 = vmatmul.mubr.bf16.gmra.mrb[84].mxu0 %v3851_v52 }
 0x175   : > { %2744 = vmatmul.mubr.bf16.gmra.mrb[84].mxu1 %v3853_v53  ;;  %2654 = vmatprep.mubr.bf16.mxu0 %v3868_v54 }
 0x176   : > { %2751 = vmatprep.mubr.bf16.mxu1 %v3870_v55 }
 0x17c   : > { %2655 = vmatmul.mubr.bf16.gmra.mrb[88].mxu0 %v3867_v60  ;;  %v474_v60 = vld [vmem:[%s5654_s26 + $0x2b8] sm:$0xff] }
 0x17d   : > { %2752 = vmatmul.mubr.bf16.gmra.mrb[88].mxu1 %v3869_v61  ;;  %2662 = vmatprep.mubr.bf16.mxu0 %v3884_v62  ;;  %v482_v61 = vld [vmem:[%s5654_s26 + $0x2f8] sm:$0xff] }
 0x17e   : > { %2759 = vmatprep.mubr.bf16.mxu1 %v3886_v63  ;;  %v3858_v9 = vcombine.high %v474_v60, %v482_v61 }
 0x184   : > { %2663 = vmatmul.mubr.bf16.gmra.mrb[92].mxu0 %v3883_v4  ;;  %v3841_v4 = vcombine.low %v458_v35, %v466_v36 }
 0x185   : > { %2760 = vmatmul.mubr.bf16.gmra.mrb[92].mxu1 %v3885_v5  ;;  %2800 = vmatprep.mubr.bf16.mxu0 %v3776_v6  ;;  %v3856_v5 = vcombine.high %v473_v56, %v481_v57 }
 0x186   : > { %2897 = vmatprep.mubr.bf16.mxu1 %v3778_v7 }
 0x18c   : > { %2801 = vmatmul.mubr.bf16.vlgmr.msra.gmra.mrb[96].mxu0 %v3775_v12 }
 0x18d   : > { %2898 = vmatmul.mubr.bf16.vlgmr.msra.gmra.mrb[96].mxu1 %v3777_v13  ;;  %2808 = vmatprep.mubr.bf16.mxu0 %v3792_v14 }
 0x18e   : > { %2905 = vmatprep.mubr.bf16.mxu1 %v3794_v15 }
 0x194   : > { %2809 = vmatmul.mubr.bf16.gmra.mrb[100].mxu0 %v3791_v20  ;;  %v490_v20 = vld [vmem:[%s5654_s26 + $0x338] sm:$0xff] }
 0x195   : > { %2906 = vmatmul.mubr.bf16.gmra.mrb[100].mxu1 %v3793_v21  ;;  %2816 = vmatprep.mubr.bf16.mxu0 %v3808_v22  ;;  %v498_v21 = vld [vmem:[%s5654_s26 + $0x378] sm:$0xff] }
 0x196   : > { %2913 = vmatprep.mubr.bf16.mxu1 %v3810_v23  ;;  %v3874_v33 = vcombine.high %v490_v20, %v498_v21 }
 0x19c   : > { %2817 = vmatmul.mubr.bf16.gmra.mrb[104].mxu0 %v3807_v28  ;;  %v3857_v28 = vcombine.low %v474_v60, %v482_v61 }
 0x19d   : > { %2914 = vmatmul.mubr.bf16.gmra.mrb[104].mxu1 %v3809_v29  ;;  %2824 = vmatprep.mubr.bf16.mxu0 %v3824_v30  ;;  %v3872_v29 = vcombine.high %v489_v16, %v497_v17 }
 0x19e   : > { %2921 = vmatprep.mubr.bf16.mxu1 %v3826_v31 }
 0x19f   : > { %v4090_v34 = vpop.f32.mrb[0].mxu0 }
 0x1a0   : > { %v4154_v37 = vpop.f32.mrb[0].mxu1  ;;  %v4091_v39 = vpop.f32.mrb[1].mxu0 }
 0x1a1   : > { %v4092_v41 = vadd.f32 %v4091_v39, %v4090_v34  ;;  %v4155_v42 = vpop.f32.mrb[1].mxu1  ;;  %v4093_v43 = vpop.f32.mrb[2].mxu0 }
 0x1a2   : > { %v4156_v46 = vadd.f32 %v4155_v42, %v4154_v37  ;;  %v4157_v47 = vpop.f32.mrb[2].mxu1  ;;  %v4094_v48 = vpop.f32.mrb[3].mxu0  ;;  %v513_v42 = vld [vmem:[%s5654_s26 + $0x3f0] sm:$0xff] }
 0x1a3   : > { %v2221_v50 = vadd.f32 %v4092_v41, %v6171_v38  ;;  %v4095_v51 = vadd.f32 %v4094_v48, %v4093_v43  ;;  %v4158_v52 = vpop.f32.mrb[3].mxu1  ;;  %v505_v41 = vld [vmem:[%s5654_s26 + $0x3b0] sm:$0xff] }
 0x1a4   : > { %v4159_v53 = vadd.f32 %v4158_v52, %v4157_v47  ;;  %2825 = vmatmul.mubr.bf16.gmra.mrb[108].mxu0 %v3823_v40  ;;  %v5017_v47 = vld [vmem:[#allocation11] sm:$0xff]   ;;  %v3888_v56 = vcombine.high %v505_v41, %v513_v42 }
 0x1a5   : > { %v6174_v54 = vadd.f32 %v4156_v46, %v2221_v50  ;;  %v2224_v55 = vadd.f32 %v4095_v51, %v6171_v38  ;;  %2922 = vmatmul.mubr.bf16.gmra.mrb[108].mxu1 %v3825_v44  ;;  %2832 = vmatprep.mubr.bf16.mxu0 %v3840_v45  ;;  %v506_v45 = vld [vmem:[%s5654_s26 + $0x3b8] sm:$0xff]  ;;  %v3871_v50 = vcombine.low %v489_v16, %v497_v17 }
 0x1a6   : > { %2929 = vmatprep.mubr.bf16.mxu1 %v3842_v49  ;;  %v514_v46 = vld [vmem:[%s5654_s26 + $0x3f8] sm:$0xff]  ;;  %4632 = vmatprep.subr.bf16.mxu0 %v5017_v47  ;;  %s5383_s26 = smov 64  }
 0x1a7   : > { %v6179_v58 = vadd.f32 %v4159_v53, %v2224_v55  ;;  %v4096_v59 = vpop.f32.mrb[4].mxu0  ;;  %v3873_v55 = vcombine.low %v490_v20, %v498_v21  ;;  %v3890_v61 = vcombine.high %v506_v45, %v514_v46  ;;  %4633 = vmatpush3.bf16.msra.mxu0 %v5017_v47 }
 0x1a8   : > { %v4160_v62 = vpop.f32.mrb[4].mxu1  ;;  %v4097_v63 = vpop.f32.mrb[5].mxu0 }
 0x1a9   : > { %v4098_v1 = vadd.f32 %v4097_v63, %v4096_v59  ;;  %v4161_v2 = vpop.f32.mrb[5].mxu1  ;;  %v4099_v3 = vpop.f32.mrb[6].mxu0 }
 0x1aa   : > { %v4162_v6 = vadd.f32 %v4161_v2, %v4160_v62  ;;  %v4163_v7 = vpop.f32.mrb[6].mxu1  ;;  %v4100_v8 = vpop.f32.mrb[7].mxu0 }
 0x1ab   : > { %v2229_v10 = vadd.f32 %v4098_v1, %v6171_v38  ;;  %v4101_v11 = vadd.f32 %v4100_v8, %v4099_v3  ;;  %v4164_v12 = vpop.f32.mrb[7].mxu1  ;;  %v3887_v8 = vcombine.low %v505_v41, %v513_v42 }
 0x1ac   : > { %v4165_v13 = vadd.f32 %v4164_v12, %v4163_v7  ;;  %2833 = vmatmul.mubr.bf16.gmra.mrb[112].mxu0 %v3839_v0  ;;  %v3889_v12 = vcombine.low %v506_v45, %v514_v46 }
 0x1ad   : > { %v6184_v14 = vadd.f32 %v4162_v6, %v2229_v10  ;;  %v2232_v15 = vadd.f32 %v4101_v11, %v6171_v38  ;;  %2930 = vmatmul.mubr.bf16.gmra.mrb[112].mxu1 %v3841_v4  ;;  %2840 = vmatprep.mubr.bf16.mxu0 %v3856_v5 }
 0x1ae   : > { %2937 = vmatprep.mubr.bf16.mxu1 %v3858_v9 }
 0x1af   : > { %v6189_v18 = vadd.f32 %v4165_v13, %v2232_v15  ;;  %v4102_v19 = vpop.f32.mrb[8].mxu0 }
 0x1b0   : > { %v4166_v22 = vpop.f32.mrb[8].mxu1  ;;  %v4103_v23 = vpop.f32.mrb[9].mxu0 }
 0x1b1   : > { %v4104_v25 = vadd.f32 %v4103_v23, %v4102_v19  ;;  %v4167_v26 = vpop.f32.mrb[9].mxu1  ;;  %v4105_v27 = vpop.f32.mrb[10].mxu0 }
 0x1b2   : > { %v4168_v30 = vadd.f32 %v4167_v26, %v4166_v22  ;;  %v4169_v31 = vpop.f32.mrb[10].mxu1  ;;  %v4106_v32 = vpop.f32.mrb[11].mxu0  ;;  %v5018_v26 = vld [vmem:[#allocation11 + $0x8] sm:$0xff]  }
 0x1b3   : > { %v2237_v34 = vadd.f32 %v4104_v25, %v6171_v38  ;;  %v4107_v35 = vadd.f32 %v4106_v32, %v4105_v27  ;;  %v4170_v36 = vpop.f32.mrb[11].mxu1  ;;  %4634 = vmatprep.subr.bf16.mxu0 %v5018_v26 }
 0x1b4   : > { %v4171_v37 = vadd.f32 %v4170_v36, %v4169_v31  ;;  %2841 = vmatmul.mubr.bf16.gmra.mrb[116].mxu0 %v3855_v24 }
 0x1b5   : > { %v6194_v39 = vadd.f32 %v4168_v30, %v2237_v34  ;;  %v2240_v40 = vadd.f32 %v4107_v35, %v6171_v38  ;;  %2938 = vmatmul.mubr.bf16.gmra.mrb[116].mxu1 %v3857_v28  ;;  %2848 = vmatprep.mubr.bf16.mxu0 %v3872_v29 }
 0x1b6   : > { %2945 = vmatprep.mubr.bf16.mxu1 %v3874_v33  ;;  %4635 = vmatpush3.bf16.msra.mxu0 %v5018_v26 }
 0x1b7   : > { %v6199_v43 = vadd.f32 %v4171_v37, %v2240_v40  ;;  %v4108_v44 = vpop.f32.mrb[12].mxu0 }
 0x1b8   : > { %v4172_v48 = vpop.f32.mrb[12].mxu1  ;;  %v4109_v49 = vpop.f32.mrb[13].mxu0 }
 0x1b9   : > { %v4110_v51 = vadd.f32 %v4109_v49, %v4108_v44  ;;  %v4173_v52 = vpop.f32.mrb[13].mxu1  ;;  %v4111_v53 = vpop.f32.mrb[14].mxu0 }
 0x1ba   : > { %v4174_v57 = vadd.f32 %v4173_v52, %v4172_v48  ;;  %v4175_v59 = vpop.f32.mrb[14].mxu1  ;;  %v4112_v60 = vpop.f32.mrb[15].mxu0 }
 0x1bb   : > { %v2245_v62 = vadd.f32 %v4110_v51, %v6171_v38  ;;  %v4113_v63 = vadd.f32 %v4112_v60, %v4111_v53  ;;  %v4176_v0 = vpop.f32.mrb[15].mxu1 }
 0x1bc   : > { %v4177_v1 = vadd.f32 %v4176_v0, %v4175_v59  ;;  %2849 = vmatmul.mubr.bf16.gmra.mrb[120].mxu0 %v3871_v50  ;;  %v5019_v0 = vld [vmem:[#allocation11 + $0x10] sm:$0xff]  }
 0x1bd   : > { %v6204_v2 = vadd.f32 %v4174_v57, %v2245_v62  ;;  %v2248_v3 = vadd.f32 %v4113_v63, %v6171_v38  ;;  %2946 = vmatmul.mubr.bf16.gmra.mrb[120].mxu1 %v3873_v55  ;;  %2856 = vmatprep.mubr.bf16.mxu0 %v3888_v56 }
 0x1be   : > { %2953 = vmatprep.mubr.bf16.mxu1 %v3890_v61  ;;  %4636 = vmatprep.subr.bf16.mxu0 %v5019_v0 }
 0x1bf   : > { %v6207_v4 = vadd.f32 %v4177_v1, %v2248_v3  ;;  %v4114_v5 = vpop.f32.mrb[16].mxu0  ;;  %4637 = vmatpush3.bf16.msra.mxu0 %v5019_v0 }
 0x1c0   : > { %v4178_v6 = vpop.f32.mrb[16].mxu1  ;;  %v4115_v7 = vpop.f32.mrb[17].mxu0 }
 0x1c1   : > { %v4116_v9 = vadd.f32 %v4115_v7, %v4114_v5  ;;  %v4179_v10 = vpop.f32.mrb[17].mxu1  ;;  %v4117_v11 = vpop.f32.mrb[18].mxu0 }
 0x1c2   : > { %v4180_v13 = vadd.f32 %v4179_v10, %v4178_v6  ;;  %v4181_v15 = vpop.f32.mrb[18].mxu1  ;;  %v4118_v16 = vpop.f32.mrb[19].mxu0 }
 0x1c3   : > { %v2253_v17 = vadd.f32 %v4116_v9, %v6171_v38  ;;  %v4119_v19 = vadd.f32 %v4118_v16, %v4117_v11  ;;  %v4182_v20 = vpop.f32.mrb[19].mxu1 }
 0x1c4   : > { %v4183_v21 = vadd.f32 %v4182_v20, %v4181_v15  ;;  %2857 = vmatmul.mubr.bf16.gmra.mrb[124].mxu0 %v3887_v8 }
 0x1c5   : > { %v6210_v22 = vadd.f32 %v4180_v13, %v2253_v17  ;;  %v2256_v23 = vadd.f32 %v4119_v19, %v6171_v38  ;;  %2954 = vmatmul.mubr.bf16.gmra.mrb[124].mxu1 %v3889_v12 }
 0x1c7   : > { %v6213_v24 = vadd.f32 %v4183_v21, %v2256_v23  ;;  %v4120_v25 = vpop.f32.mrb[20].mxu0 }
 0x1c8   : > { %v4184_v27 = vpop.f32.mrb[20].mxu1  ;;  %v4121_v28 = vpop.f32.mrb[21].mxu0 }
 0x1c9   : > { %v4122_v29 = vadd.f32 %v4121_v28, %v4120_v25  ;;  %v4185_v30 = vpop.f32.mrb[21].mxu1  ;;  %v4123_v31 = vpop.f32.mrb[22].mxu0 }
 0x1ca   : > { %v4186_v32 = vadd.f32 %v4185_v30, %v4184_v27  ;;  %v4187_v33 = vpop.f32.mrb[22].mxu1  ;;  %v4124_v34 = vpop.f32.mrb[23].mxu0 }
 0x1cb   : > { %v2261_v35 = vadd.f32 %v4122_v29, %v6171_v38  ;;  %v4125_v36 = vadd.f32 %v4124_v34, %v4123_v31  ;;  %v4188_v37 = vpop.f32.mrb[23].mxu1 }
 0x1cc   : > { %v4189_v40 = vadd.f32 %v4188_v37, %v4187_v33 }
 0x1cd   : > { %v6216_v41 = vadd.f32 %v4186_v32, %v2261_v35  ;;  %v2264_v42 = vadd.f32 %v4125_v36, %v6171_v38 }
 0x1cf   : > { %v6219_v44 = vadd.f32 %v4189_v40, %v2264_v42  ;;  %v4126_v45 = vpop.f32.mrb[24].mxu0 }
 0x1d0   : > { %v4190_v46 = vpop.f32.mrb[24].mxu1  ;;  %v4127_v47 = vpop.f32.mrb[25].mxu0 }
 0x1d1   : > { %v4128_v48 = vadd.f32 %v4127_v47, %v4126_v45  ;;  %v4191_v49 = vpop.f32.mrb[25].mxu1  ;;  %v4129_v50 = vpop.f32.mrb[26].mxu0 }
 0x1d2   : > { %v4192_v51 = vadd.f32 %v4191_v49, %v4190_v46  ;;  %v4193_v52 = vpop.f32.mrb[26].mxu1  ;;  %v4130_v53 = vpop.f32.mrb[27].mxu0 }
 0x1d3   : > { %v2269_v55 = vadd.f32 %v4128_v48, %v6171_v38  ;;  %v4131_v56 = vadd.f32 %v4130_v53, %v4129_v50  ;;  %v4194_v57 = vpop.f32.mrb[27].mxu1  ;;  %v5020_v53 = vld [vmem:[#allocation11 + $0x18] sm:$0xff]  }
 0x1d4   : > { %v4195_v59 = vadd.f32 %v4194_v57, %v4193_v52  ;;  %4638 = vmatprep.subr.bf16.mxu0 %v5020_v53 }
 0x1d5   : > { %v6222_v60 = vadd.f32 %v4192_v51, %v2269_v55  ;;  %v2272_v61 = vadd.f32 %v4131_v56, %v6171_v38  ;;  %4639 = vmatpush3.bf16.msra.mxu0 %v5020_v53 }
 0x1d7   : > { %v6225_v62 = vadd.f32 %v4195_v59, %v2272_v61  ;;  %v4132_v63 = vpop.f32.mrb[28].mxu0 }
 0x1d8   : > { %v4196_v1 = vpop.f32.mrb[28].mxu1  ;;  %v4133_v3 = vpop.f32.mrb[29].mxu0 }
 0x1d9   : > { %v4134_v5 = vadd.f32 %v4133_v3, %v4132_v63  ;;  %v4197_v6 = vpop.f32.mrb[29].mxu1  ;;  %v4135_v7 = vpop.f32.mrb[30].mxu0 }
 0x1da   : > { %v4198_v8 = vadd.f32 %v4197_v6, %v4196_v1  ;;  %v4199_v9 = vpop.f32.mrb[30].mxu1  ;;  %v4136_v10 = vpop.f32.mrb[31].mxu0 }
 0x1db   : > { %v2277_v11 = vadd.f32 %v4134_v5, %v6171_v38  ;;  %v4137_v12 = vadd.f32 %v4136_v10, %v4135_v7  ;;  %v4200_v13 = vpop.f32.mrb[31].mxu1 }
 0x1dc   : > { %v4201_v15 = vadd.f32 %v4200_v13, %v4199_v9 }
 0x1dd   : > { %v6228_v16 = vadd.f32 %v4198_v8, %v2277_v11  ;;  %v2280_v17 = vadd.f32 %v4137_v12, %v6171_v38  ;;  %v5382_v12 = vmov 0.0|0.0  }
 0x1de   : > { %4758 = vmatprep.subr.bf16.mxu0 %v5382_v12  ;;  %4726 = vmatprep.subr.bf16.mxu1 %v5382_v12 }
 0x1df   : > { %v6231_v19 = vadd.f32 %v4201_v15, %v2280_v17  ;;  %v4218_v20 = vpop.f32.mrb[32].mxu0 }
 0x1e0   : > { %v4282_v21 = vpop.f32.mrb[32].mxu1  ;;  %v4219_v23 = vpop.f32.mrb[33].mxu0 }
 0x1e1   : > { %v4220_v25 = vadd.f32 %v4219_v23, %v4218_v20  ;;  %v4283_v26 = vpop.f32.mrb[33].mxu1  ;;  %v4221_v27 = vpop.f32.mrb[34].mxu0 }
 0x1e2   : > { %v4284_v28 = vadd.f32 %v4283_v26, %v4282_v21  ;;  %v4285_v29 = vpop.f32.mrb[34].mxu1  ;;  %v4222_v30 = vpop.f32.mrb[35].mxu0 }
 0x1e3   : > { %v2415_v31 = vadd.f32 %v4220_v25, %v6174_v54  ;;  %v4223_v32 = vadd.f32 %v4222_v30, %v4221_v27  ;;  %v4286_v33 = vpop.f32.mrb[35].mxu1 }
 0x1e4   : > { %v4287_v34 = vadd.f32 %v4286_v33, %v4285_v29 }
 0x1e5   : > { %v6234_v35 = vadd.f32 %v4284_v28, %v2415_v31  ;;  %v2418_v38 = vadd.f32 %v4223_v32, %v6179_v58 }
 0x1e7   : > { %v6237_v36 = vadd.f32 %v4287_v34, %v2418_v38  ;;  %v4224_v37 = vpop.f32.mrb[36].mxu0 }
 0x1e8   : > { %v4288_v40 = vpop.f32.mrb[36].mxu1  ;;  %v4225_v42 = vpop.f32.mrb[37].mxu0 }
 0x1e9   : > { %v4226_v45 = vadd.f32 %v4225_v42, %v4224_v37  ;;  %v4289_v46 = vpop.f32.mrb[37].mxu1  ;;  %v4227_v47 = vpop.f32.mrb[38].mxu0 }
 0x1ea   : > { %v4290_v48 = vadd.f32 %v4289_v46, %v4288_v40  ;;  %v4291_v49 = vpop.f32.mrb[38].mxu1  ;;  %v4228_v50 = vpop.f32.mrb[39].mxu0 }
 0x1eb   : > { %v2423_v54 = vadd.f32 %v4226_v45, %v6184_v14  ;;  %v4229_v51 = vadd.f32 %v4228_v50, %v4227_v47  ;;  %v4292_v52 = vpop.f32.mrb[39].mxu1 }
 0x1ec   : > { %v4293_v55 = vadd.f32 %v4292_v52, %v4291_v49 }
 0x1ed   : > { %v6240_v56 = vadd.f32 %v4290_v48, %v2423_v54  ;;  %v2426_v58 = vadd.f32 %v4229_v51, %v6189_v18 }
 0x1ef   : > { %v6243_v57 = vadd.f32 %v4293_v55, %v2426_v58  ;;  %v4230_v59 = vpop.f32.mrb[40].mxu0 }
 0x1f0   : > { %v4294_v61 = vpop.f32.mrb[40].mxu1  ;;  %v4231_v63 = vpop.f32.mrb[41].mxu0 }
 0x1f1   : > { %v4232_v0 = vadd.f32 %v4231_v63, %v4230_v59  ;;  %v4295_v1 = vpop.f32.mrb[41].mxu1  ;;  %v4233_v3 = vpop.f32.mrb[42].mxu0 }
 0x1f2   : > { %v4296_v5 = vadd.f32 %v4295_v1, %v4294_v61  ;;  %v4297_v14 = vpop.f32.mrb[42].mxu1  ;;  %v4234_v6 = vpop.f32.mrb[43].mxu0 }
 0x1f3   : > { %v2431_v7 = vadd.f32 %v4232_v0, %v6194_v39  ;;  %v4235_v8 = vadd.f32 %v4234_v6, %v4233_v3  ;;  %v4298_v9 = vpop.f32.mrb[43].mxu1 }
 0x1f4   : > { %v4299_v10 = vadd.f32 %v4298_v9, %v4297_v14 }
 0x1f5   : > { %v6246_v11 = vadd.f32 %v4296_v5, %v2431_v7  ;;  %v2434_v18 = vadd.f32 %v4235_v8, %v6199_v43 }
 0x1f7   : > { %v6251_v13 = vadd.f32 %v4299_v10, %v2434_v18  ;;  %v4236_v15 = vpop.f32.mrb[44].mxu0 }
 0x1f8   : > { %v4300_v17 = vpop.f32.mrb[44].mxu1  ;;  %v4237_v20 = vpop.f32.mrb[45].mxu0 }
 0x1f9   : > { %v4238_v21 = vadd.f32 %v4237_v20, %v4236_v15  ;;  %v4301_v23 = vpop.f32.mrb[45].mxu1  ;;  %v4239_v39 = vpop.f32.mrb[46].mxu0 }
 0x1fa   : > { %v4302_v25 = vadd.f32 %v4301_v23, %v4300_v17  ;;  %v4303_v26 = vpop.f32.mrb[46].mxu1  ;;  %v4240_v27 = vpop.f32.mrb[47].mxu0 }
 0x1fb   : > { %v2439_v28 = vadd.f32 %v4238_v21, %v6204_v2  ;;  %v4241_v29 = vadd.f32 %v4240_v27, %v4239_v39  ;;  %v4304_v43 = vpop.f32.mrb[47].mxu1 }
 0x1fc   : > { %v4305_v30 = vadd.f32 %v4304_v43, %v4303_v26 }
 0x1fd   : > { %v6254_v31 = vadd.f32 %v4302_v25, %v2439_v28  ;;  %v2442_v32 = vadd.f32 %v4241_v29, %v6207_v4 }
 0x1ff   : > { %v6257_v33 = vadd.f32 %v4305_v30, %v2442_v32  ;;  %v4242_v34 = vpop.f32.mrb[48].mxu0 }
 0x200   : > { %v4306_v38 = vpop.f32.mrb[48].mxu1  ;;  %v4243_v37 = vpop.f32.mrb[49].mxu0 }
 0x201   : > { %v4244_v40 = vadd.f32 %v4243_v37, %v4242_v34  ;;  %v4307_v42 = vpop.f32.mrb[49].mxu1  ;;  %v4245_v45 = vpop.f32.mrb[50].mxu0 }
 0x202   : > { %v4308_v46 = vadd.f32 %v4307_v42, %v4306_v38  ;;  %v4309_v47 = vpop.f32.mrb[50].mxu1  ;;  %v4246_v48 = vpop.f32.mrb[51].mxu0 }
 0x203   : > { %v2447_v2 = vadd.f32 %v4244_v40, %v6210_v22  ;;  %v4247_v49 = vadd.f32 %v4246_v48, %v4245_v45  ;;  %v4310_v50 = vpop.f32.mrb[51].mxu1 }
 0x204   : > { %v4311_v54 = vadd.f32 %v4310_v50, %v4309_v47 }
 0x205   : > { %v6260_v51 = vadd.f32 %v4308_v46, %v2447_v2  ;;  %v2450_v4 = vadd.f32 %v4247_v49, %v6213_v24 }
 0x207   : > { %v6263_v52 = vadd.f32 %v4311_v54, %v2450_v4  ;;  %v4248_v53 = vpop.f32.mrb[52].mxu0 }
 0x208   : > { %v4312_v55 = vpop.f32.mrb[52].mxu1  ;;  %v4249_v58 = vpop.f32.mrb[53].mxu0 }
 0x209   : > { %v4250_v59 = vadd.f32 %v4249_v58, %v4248_v53  ;;  %v4313_v61 = vpop.f32.mrb[53].mxu1  ;;  %v4251_v63 = vpop.f32.mrb[54].mxu0 }
 0x20a   : > { %v4314_v0 = vadd.f32 %v4313_v61, %v4312_v55  ;;  %v4315_v1 = vpop.f32.mrb[54].mxu1  ;;  %v4252_v3 = vpop.f32.mrb[55].mxu0 }
 0x20b   : > { %v2455_v22 = vadd.f32 %v4250_v59, %v6216_v41  ;;  %v4253_v5 = vadd.f32 %v4252_v3, %v4251_v63  ;;  %v4316_v14 = vpop.f32.mrb[55].mxu1 }
 0x20c   : > { %v4317_v6 = vadd.f32 %v4316_v14, %v4315_v1 }
 0x20d   : > { %v6266_v7 = vadd.f32 %v4314_v0, %v2455_v22  ;;  %v2458_v24 = vadd.f32 %v4253_v5, %v6219_v44 }
 0x20f   : > { %v6269_v8 = vadd.f32 %v4317_v6, %v2458_v24  ;;  %v4254_v9 = vpop.f32.mrb[56].mxu0 }
 0x210   : > { %v4318_v10 = vpop.f32.mrb[56].mxu1  ;;  %v4255_v18 = vpop.f32.mrb[57].mxu0 }
 0x211   : > { %v4256_v15 = vadd.f32 %v4255_v18, %v4254_v9  ;;  %v4319_v17 = vpop.f32.mrb[57].mxu1  ;;  %v4257_v20 = vpop.f32.mrb[58].mxu0 }
 0x212   : > { %v4320_v21 = vadd.f32 %v4319_v17, %v4318_v10  ;;  %v4321_v23 = vpop.f32.mrb[58].mxu1  ;;  %v4258_v39 = vpop.f32.mrb[59].mxu0 }
 0x213   : > { %v2463_v41 = vadd.f32 %v4256_v15, %v6222_v60  ;;  %v4259_v25 = vadd.f32 %v4258_v39, %v4257_v20  ;;  %v4322_v26 = vpop.f32.mrb[59].mxu1 }
 0x214   : > { %v4323_v27 = vadd.f32 %v4322_v26, %v4321_v23 }
 0x215   : > { %v6272_v28 = vadd.f32 %v4320_v21, %v2463_v41  ;;  %v2466_v44 = vadd.f32 %v4259_v25, %v6225_v62 }
 0x217   : > { %v6275_v29 = vadd.f32 %v4323_v27, %v2466_v44  ;;  %v4260_v43 = vpop.f32.mrb[60].mxu0 }
 0x218   : > { %v4324_v30 = vpop.f32.mrb[60].mxu1  ;;  %v4261_v32 = vpop.f32.mrb[61].mxu0 }
 0x219   : > { %v4262_v34 = vadd.f32 %v4261_v32, %v4260_v43  ;;  %v4325_v38 = vpop.f32.mrb[61].mxu1  ;;  %v4263_v37 = vpop.f32.mrb[62].mxu0 }
 0x21a   : > { %v4326_v40 = vadd.f32 %v4325_v38, %v4324_v30  ;;  %v4327_v42 = vpop.f32.mrb[62].mxu1  ;;  %v4264_v45 = vpop.f32.mrb[63].mxu0 }
 0x21b   : > { %v2471_v60 = vadd.f32 %v4262_v34, %v6228_v16  ;;  %v4265_v46 = vadd.f32 %v4264_v45, %v4263_v37  ;;  %v4328_v47 = vpop.f32.mrb[63].mxu1 }
 0x21c   : > { %v4329_v48 = vadd.f32 %v4328_v47, %v4327_v42 }
 0x21d   : > { %v6278_v2 = vadd.f32 %v4326_v40, %v2471_v60  ;;  %v2474_v62 = vadd.f32 %v4265_v46, %v6231_v19 }
 0x21f   : > { %v6281_v49 = vadd.f32 %v4329_v48, %v2474_v62  ;;  %v4346_v50 = vpop.f32.mrb[64].mxu0 }
 0x220   : > { %v4410_v54 = vpop.f32.mrb[64].mxu1  ;;  %v4347_v4 = vpop.f32.mrb[65].mxu0 }
 0x221   : > { %v4348_v53 = vadd.f32 %v4347_v4, %v4346_v50  ;;  %v4411_v55 = vpop.f32.mrb[65].mxu1  ;;  %v4349_v58 = vpop.f32.mrb[66].mxu0 }
 0x222   : > { %v4412_v59 = vadd.f32 %v4411_v55, %v4410_v54  ;;  %v4413_v61 = vpop.f32.mrb[66].mxu1  ;;  %v4350_v63 = vpop.f32.mrb[67].mxu0 }
 0x223   : > { %v2609_v16 = vadd.f32 %v4348_v53, %v6234_v35  ;;  %v4351_v0 = vadd.f32 %v4350_v63, %v4349_v58  ;;  %v4414_v1 = vpop.f32.mrb[67].mxu1 }
 0x224   : > { %v4415_v3 = vadd.f32 %v4414_v1, %v4413_v61 }
 0x225   : > { %v6284_v22 = vadd.f32 %v4412_v59, %v2609_v16  ;;  %v2612_v19 = vadd.f32 %v4351_v0, %v6237_v36 }
 0x227   : > { %v6287_v5 = vadd.f32 %v4415_v3, %v2612_v19  ;;  %v4352_v14 = vpop.f32.mrb[68].mxu0 }
 0x228   : > { %v4416_v6 = vpop.f32.mrb[68].mxu1  ;;  %v4353_v24 = vpop.f32.mrb[69].mxu0 }
 0x229   : > { %v4354_v9 = vadd.f32 %v4353_v24, %v4352_v14  ;;  %v4417_v10 = vpop.f32.mrb[69].mxu1  ;;  %v4355_v18 = vpop.f32.mrb[70].mxu0 }
 0x22a   : > { %v4418_v15 = vadd.f32 %v4417_v10, %v4416_v6  ;;  %v4419_v17 = vpop.f32.mrb[70].mxu1  ;;  %v4356_v20 = vpop.f32.mrb[71].mxu0 }
 0x22b   : > { %v2617_v35 = vadd.f32 %v4354_v9, %v6240_v56  ;;  %v4357_v21 = vadd.f32 %v4356_v20, %v4355_v18  ;;  %v4420_v23 = vpop.f32.mrb[71].mxu1 }
 0x22c   : > { %v4421_v39 = vadd.f32 %v4420_v23, %v4419_v17 }
 0x22d   : > { %v6290_v41 = vadd.f32 %v4418_v15, %v2617_v35  ;;  %v2620_v36 = vadd.f32 %v4357_v21, %v6243_v57 }
 0x22f   : > { %v6293_v25 = vadd.f32 %v4421_v39, %v2620_v36  ;;  %v4358_v26 = vpop.f32.mrb[72].mxu0 }
 0x230   : > { %v4422_v27 = vpop.f32.mrb[72].mxu1  ;;  %v4359_v44 = vpop.f32.mrb[73].mxu0 }
 0x231   : > { %v4360_v43 = vadd.f32 %v4359_v44, %v4358_v26  ;;  %v4423_v30 = vpop.f32.mrb[73].mxu1  ;;  %v4361_v32 = vpop.f32.mrb[74].mxu0 }
 0x232   : > { %v4424_v34 = vadd.f32 %v4423_v30, %v4422_v27  ;;  %v4425_v38 = vpop.f32.mrb[74].mxu1  ;;  %v4362_v37 = vpop.f32.mrb[75].mxu0 }
 0x233   : > { %v2625_v56 = vadd.f32 %v4360_v43, %v6246_v11  ;;  %v4363_v40 = vadd.f32 %v4362_v37, %v4361_v32  ;;  %v4426_v42 = vpop.f32.mrb[75].mxu1 }
 0x234   : > { %v4427_v45 = vadd.f32 %v4426_v42, %v4425_v38 }
 0x235   : > { %v6296_v60 = vadd.f32 %v4424_v34, %v2625_v56  ;;  %v2628_v57 = vadd.f32 %v4363_v40, %v6251_v13 }
 0x237   : > { %v6299_v46 = vadd.f32 %v4427_v45, %v2628_v57  ;;  %v4364_v47 = vpop.f32.mrb[76].mxu0 }
 0x238   : > { %v4428_v48 = vpop.f32.mrb[76].mxu1  ;;  %v4365_v62 = vpop.f32.mrb[77].mxu0 }
 0x239   : > { %v4366_v50 = vadd.f32 %v4365_v62, %v4364_v47  ;;  %v4429_v54 = vpop.f32.mrb[77].mxu1  ;;  %v4367_v4 = vpop.f32.mrb[78].mxu0 }
 0x23a   : > { %v4430_v53 = vadd.f32 %v4429_v54, %v4428_v48  ;;  %v4431_v55 = vpop.f32.mrb[78].mxu1  ;;  %v4368_v58 = vpop.f32.mrb[79].mxu0 }
 0x23b   : > { %v2633_v11 = vadd.f32 %v4366_v50, %v6254_v31  ;;  %v4369_v59 = vadd.f32 %v4368_v58, %v4367_v4  ;;  %v4432_v61 = vpop.f32.mrb[79].mxu1 }
 0x23c   : > { %v4433_v63 = vadd.f32 %v4432_v61, %v4431_v55 }
 0x23d   : > { %v6302_v16 = vadd.f32 %v4430_v53, %v2633_v11  ;;  %v2636_v13 = vadd.f32 %v4369_v59, %v6257_v33 }
 0x23f   : > { %v6305_v0 = vadd.f32 %v4433_v63, %v2636_v13  ;;  %v4370_v1 = vpop.f32.mrb[80].mxu0 }
 0x240   : > { %v4434_v3 = vpop.f32.mrb[80].mxu1  ;;  %v4371_v19 = vpop.f32.mrb[81].mxu0 }
 0x241   : > { %v4372_v14 = vadd.f32 %v4371_v19, %v4370_v1  ;;  %v4435_v6 = vpop.f32.mrb[81].mxu1  ;;  %v4373_v24 = vpop.f32.mrb[82].mxu0 }
 0x242   : > { %v4436_v9 = vadd.f32 %v4435_v6, %v4434_v3  ;;  %v4437_v10 = vpop.f32.mrb[82].mxu1  ;;  %v4374_v18 = vpop.f32.mrb[83].mxu0 }
 0x243   : > { %v2641_v31 = vadd.f32 %v4372_v14, %v6260_v51  ;;  %v4375_v15 = vadd.f32 %v4374_v18, %v4373_v24  ;;  %v4438_v17 = vpop.f32.mrb[83].mxu1 }
 0x244   : > { %v4439_v20 = vadd.f32 %v4438_v17, %v4437_v10 }
 0x245   : > { %v6308_v35 = vadd.f32 %v4436_v9, %v2641_v31  ;;  %v2644_v33 = vadd.f32 %v4375_v15, %v6263_v52 }
 0x247   : > { %v6311_v21 = vadd.f32 %v4439_v20, %v2644_v33  ;;  %v4376_v23 = vpop.f32.mrb[84].mxu0 }
 0x248   : > { %v4440_v39 = vpop.f32.mrb[84].mxu1  ;;  %v4377_v36 = vpop.f32.mrb[85].mxu0 }
 0x249   : > { %v4378_v26 = vadd.f32 %v4377_v36, %v4376_v23  ;;  %v4441_v27 = vpop.f32.mrb[85].mxu1  ;;  %v4379_v44 = vpop.f32.mrb[86].mxu0 }
 0x24a   : > { %v4442_v43 = vadd.f32 %v4441_v27, %v4440_v39  ;;  %v4443_v30 = vpop.f32.mrb[86].mxu1  ;;  %v4380_v32 = vpop.f32.mrb[87].mxu0 }
 0x24b   : > { %v2649_v51 = vadd.f32 %v4378_v26, %v6266_v7  ;;  %v4381_v34 = vadd.f32 %v4380_v32, %v4379_v44  ;;  %v4444_v38 = vpop.f32.mrb[87].mxu1 }
 0x24c   : > { %v4445_v37 = vadd.f32 %v4444_v38, %v4443_v30 }
 0x24d   : > { %v6314_v56 = vadd.f32 %v4442_v43, %v2649_v51  ;;  %v2652_v52 = vadd.f32 %v4381_v34, %v6269_v8 }
 0x24f   : > { %v6317_v40 = vadd.f32 %v4445_v37, %v2652_v52  ;;  %v4382_v42 = vpop.f32.mrb[88].mxu0 }
 0x250   : > { %v4446_v45 = vpop.f32.mrb[88].mxu1  ;;  %v4383_v57 = vpop.f32.mrb[89].mxu0 }
 0x251   : > { %v4384_v47 = vadd.f32 %v4383_v57, %v4382_v42  ;;  %v4447_v48 = vpop.f32.mrb[89].mxu1  ;;  %v4385_v62 = vpop.f32.mrb[90].mxu0 }
 0x252   : > { %v4448_v50 = vadd.f32 %v4447_v48, %v4446_v45  ;;  %v4449_v54 = vpop.f32.mrb[90].mxu1  ;;  %v4386_v4 = vpop.f32.mrb[91].mxu0 }
 0x253   : > { %v2657_v7 = vadd.f32 %v4384_v47, %v6272_v28  ;;  %v4387_v53 = vadd.f32 %v4386_v4, %v4385_v62  ;;  %v4450_v55 = vpop.f32.mrb[91].mxu1 }
 0x254   : > { %v4451_v58 = vadd.f32 %v4450_v55, %v4449_v54 }
 0x255   : > { %v6320_v11 = vadd.f32 %v4448_v50, %v2657_v7  ;;  %v2660_v8 = vadd.f32 %v4387_v53, %v6275_v29 }
 0x257   : > { %v6323_v59 = vadd.f32 %v4451_v58, %v2660_v8  ;;  %v4388_v61 = vpop.f32.mrb[92].mxu0 }
 0x258   : > { %v4452_v63 = vpop.f32.mrb[92].mxu1  ;;  %v4389_v13 = vpop.f32.mrb[93].mxu0 }
 0x259   : > { %v4390_v1 = vadd.f32 %v4389_v13, %v4388_v61  ;;  %v4453_v3 = vpop.f32.mrb[93].mxu1  ;;  %v4391_v19 = vpop.f32.mrb[94].mxu0 }
 0x25a   : > { %v4454_v14 = vadd.f32 %v4453_v3, %v4452_v63  ;;  %v4455_v6 = vpop.f32.mrb[94].mxu1  ;;  %v4392_v24 = vpop.f32.mrb[95].mxu0 }
 0x25b   : > { %v2665_v28 = vadd.f32 %v4390_v1, %v6278_v2  ;;  %v4393_v9 = vadd.f32 %v4392_v24, %v4391_v19  ;;  %v4456_v10 = vpop.f32.mrb[95].mxu1 }
 0x25c   : > { %v4457_v18 = vadd.f32 %v4456_v10, %v4455_v6 }
 0x25d   : > { %v6326_v31 = vadd.f32 %v4454_v14, %v2665_v28  ;;  %v2668_v29 = vadd.f32 %v4393_v9, %v6281_v49 }
 0x25f   : > { %v6329_v15 = vadd.f32 %v4457_v18, %v2668_v29  ;;  %v4474_v17 = vpop.f32.mrb[96].mxu0 }
 0x260   : > { %v4538_v20 = vpop.f32.mrb[96].mxu1  ;;  %v4475_v33 = vpop.f32.mrb[97].mxu0 }
 0x261   : > { %v4476_v23 = vadd.f32 %v4475_v33, %v4474_v17  ;;  %v4539_v39 = vpop.f32.mrb[97].mxu1  ;;  %v4477_v36 = vpop.f32.mrb[98].mxu0 }
 0x262   : > { %v4540_v26 = vadd.f32 %v4539_v39, %v4538_v20  ;;  %v4541_v27 = vpop.f32.mrb[98].mxu1  ;;  %v4478_v44 = vpop.f32.mrb[99].mxu0 }
 0x263   : > { %v2803_v2 = vadd.f32 %v4476_v23, %v6284_v22  ;;  %v4479_v43 = vadd.f32 %v4478_v44, %v4477_v36  ;;  %v4542_v30 = vpop.f32.mrb[99].mxu1 }
 0x264   : > { %v4543_v32 = vadd.f32 %v4542_v30, %v4541_v27 }
 0x265   : > { %v2900_v51 = vadd.f32 %v4540_v26, %v2803_v2  ;;  %v2806_v34 = vadd.f32 %v4479_v43, %v6287_v5 }
 0x267   : > { %v2903_v49 = vadd.f32 %v4543_v32, %v2806_v34  ;;  %v4480_v38 = vpop.f32.mrb[100].mxu0  ;;  %v2962_v42 = vmax.f32 %v2900_v51, 0.0 }
 0x268   : > { %v4544_v37 = vpop.f32.mrb[100].mxu1  ;;  %v4481_v52 = vpop.f32.mrb[101].mxu0 }
 0x269   : > { %v2963_v45 = vmax.f32 %v2903_v49, 0.0  ;;  %v4482_v57 = vadd.f32 %v4481_v52, %v4480_v38  ;;  %v4545_v47 = vpop.f32.mrb[101].mxu1  ;;  %v4483_v48 = vpop.f32.mrb[102].mxu0 }
 0x26a   : > { %v4546_v62 = vadd.f32 %v4545_v47, %v4544_v37  ;;  %v4547_v50 = vpop.f32.mrb[102].mxu1  ;;  %v4484_v54 = vpop.f32.mrb[103].mxu0 }
 0x26b   : > { %v2978_v22 = vpack.c.bf16 %v2963_v45, %v2962_v42  ;;  %v2811_v4 = vadd.f32 %v4482_v57, %v6290_v41  ;;  %v4485_v7 = vadd.f32 %v4484_v54, %v4483_v48  ;;  %v4548_v53 = vpop.f32.mrb[103].mxu1 }
 0x26c   : > { %v4549_v55 = vadd.f32 %v4548_v53, %v4547_v50 }
 0x26d   : > { %v2908_v5 = vadd.f32 %v4546_v62, %v2811_v4  ;;  %v2814_v58 = vadd.f32 %v4485_v7, %v6293_v25  ;;  %4640 = vmatprep.mubr.msk.bf16.mxu0 %vm3025_vm2, %v2978_v22 }
 0x26f   : > { %v2911_v8 = vadd.f32 %v4549_v55, %v2814_v58  ;;  %v4486_v61 = vpop.f32.mrb[104].mxu0  ;;  %v2964_v1 = vmax.f32 %v2908_v5, 0.0 }
 0x270   : > { %v4487_v63 = vpop.f32.mrb[105].mxu0  ;;  %v4550_v13 = vpop.f32.mrb[104].mxu1 }
 0x271   : > { %v2965_v3 = vmax.f32 %v2911_v8, 0.0  ;;  %v4488_v19 = vadd.f32 %v4487_v63, %v4486_v61  ;;  %v4489_v14 = vpop.f32.mrb[106].mxu0  ;;  %v4551_v6 = vpop.f32.mrb[105].mxu1 }
 0x272   : > { %v4552_v24 = vadd.f32 %v4551_v6, %v4550_v13  ;;  %v4490_v28 = vpop.f32.mrb[107].mxu0  ;;  %v4553_v41 = vpop.f32.mrb[106].mxu1 }
 0x273   : > { %v2979_v9 = vpack.c.bf16 %v2965_v3, %v2964_v1  ;;  %v2819_v10 = vadd.f32 %v4488_v19, %v6296_v60  ;;  %v4491_v18 = vadd.f32 %v4490_v28, %v4489_v14  ;;  %v4554_v29 = vpop.f32.mrb[107].mxu1 }
 0x274   : > { %v4555_v25 = vadd.f32 %v4554_v29, %v4553_v41 }
 0x275   : > { %v2916_v17 = vadd.f32 %v4552_v24, %v2819_v10  ;;  %v2822_v20 = vadd.f32 %v4491_v18, %v6299_v46  ;;  %4641 = vmatmul.mubr.msk.bf16.vlgmr.msra.gmra.mrb[128].mxu0 %vm3025_vm2, %v2979_v9 }
 0x276   : > { %4760 = vmatpush3.bf16.msra.mxu0 %v2978_v22 }
 0x277   : > { %v2919_v33 = vadd.f32 %v4555_v25, %v2822_v20  ;;  %v4492_v23 = vpop.f32.mrb[108].mxu0  ;;  %4761 = vmatprep.subr.bf16.mxu0 %v5382_v12  ;;  %v2966_v26 = vmax.f32 %v2916_v17, 0.0 }
 0x278   : > { %v4493_v39 = vpop.f32.mrb[109].mxu0  ;;  %v4556_v36 = vpop.f32.mrb[108].mxu1 }
 0x279   : > { %v2967_v27 = vmax.f32 %v2919_v33, 0.0  ;;  %v4494_v44 = vadd.f32 %v4493_v39, %v4492_v23  ;;  %v4495_v2 = vpop.f32.mrb[110].mxu0  ;;  %v4557_v60 = vpop.f32.mrb[109].mxu1 }
 0x27a   : > { %v4558_v43 = vadd.f32 %v4557_v60, %v4556_v36  ;;  %4763 = vmatpush3.bf16.msra.mxu0 %v2979_v9  ;;  %v4496_v30 = vpop.f32.mrb[111].mxu0  ;;  %v4559_v32 = vpop.f32.mrb[110].mxu1 }
 0x27b   : > { %v2980_v51 = vpack.c.bf16 %v2967_v27, %v2966_v26  ;;  %v2827_v46 = vadd.f32 %v4494_v44, %v6302_v16  ;;  %v4497_v34 = vadd.f32 %v4496_v30, %v4495_v2  ;;  %v4560_v49 = vpop.f32.mrb[111].mxu1  ;;  %4764 = vmatprep.subr.bf16.mxu0 %v5382_v12 }
 0x27c   : > { %v4561_v38 = vadd.f32 %v4560_v49, %v4559_v32 }
 0x27d   : > { %v2924_v37 = vadd.f32 %v4558_v43, %v2827_v46  ;;  %v2830_v52 = vadd.f32 %v4497_v34, %v6305_v0  ;;  %4644 = vmatprep.mubr.msk.bf16.mxu0 %vm3025_vm2, %v2980_v51 }
 0x27e   : > { %4766 = vmatpush3.bf16.msra.mxu0 %v2980_v51 }
 0x27f   : > { %v2927_v42 = vadd.f32 %v4561_v38, %v2830_v52  ;;  %v4498_v45 = vpop.f32.mrb[112].mxu0  ;;  %4767 = vmatprep.subr.bf16.mxu0 %v5382_v12  ;;  %v2968_v48 = vmax.f32 %v2924_v37, 0.0 }
 0x280   : > { %v4499_v57 = vpop.f32.mrb[113].mxu0  ;;  %v4562_v47 = vpop.f32.mrb[112].mxu1 }
 0x281   : > { %v2969_v62 = vmax.f32 %v2927_v42, 0.0  ;;  %v4500_v16 = vadd.f32 %v4499_v57, %v4498_v45  ;;  %v4501_v50 = vpop.f32.mrb[114].mxu0  ;;  %v4563_v54 = vpop.f32.mrb[113].mxu1 }
 0x282   : > { %v4564_v22 = vadd.f32 %v4563_v54, %v4562_v47  ;;  %v4502_v4 = vpop.f32.mrb[115].mxu0  ;;  %v4565_v7 = vpop.f32.mrb[114].mxu1 }
 0x283   : > { %v2981_v53 = vpack.c.bf16 %v2969_v62, %v2968_v48  ;;  %v2835_v0 = vadd.f32 %v4500_v16, %v6308_v35  ;;  %v4503_v55 = vadd.f32 %v4502_v4, %v4501_v50  ;;  %v4566_v5 = vpop.f32.mrb[115].mxu1 }
 0x284   : > { %v4567_v58 = vadd.f32 %v4566_v5, %v4565_v7 }
 0x285   : > { %v2932_v8 = vadd.f32 %v4564_v22, %v2835_v0  ;;  %v2838_v61 = vadd.f32 %v4503_v55, %v6311_v21  ;;  %4645 = vmatmul.mubr.msk.bf16.gmra.mrb[132].mxu0 %vm3025_vm2, %v2981_v53 }
 0x286   : > { %4769 = vmatpush3.bf16.msra.mxu0 %v2981_v53 }
 0x287   : > { %v2935_v63 = vadd.f32 %v4567_v58, %v2838_v61  ;;  %v4504_v13 = vpop.f32.mrb[116].mxu0  ;;  %4770 = vmatprep.subr.bf16.mxu0 %v5382_v12  ;;  %v2970_v19 = vmax.f32 %v2932_v8, 0.0 }
 0x288   : > { %v4505_v1 = vpop.f32.mrb[117].mxu0  ;;  %v4568_v3 = vpop.f32.mrb[116].mxu1 }
 0x289   : > { %v2971_v14 = vmax.f32 %v2935_v63, 0.0  ;;  %v4506_v6 = vadd.f32 %v4505_v1, %v4504_v13  ;;  %v4507_v24 = vpop.f32.mrb[118].mxu0  ;;  %v4569_v35 = vpop.f32.mrb[117].mxu1  ;;  %v6362_v63 = vld [vmem:[#allocation12] ss:$0 sm:$0xff] }
 0x28a   : > { %v4570_v28 = vadd.f32 %v4569_v35, %v4568_v3  ;;  %v4508_v41 = vpop.f32.mrb[119].mxu0  ;;  %v4571_v9 = vpop.f32.mrb[118].mxu1 }
 0x28b   : > { %v2982_v10 = vpack.c.bf16 %v2971_v14, %v2970_v19  ;;  %v2843_v21 = vadd.f32 %v4506_v6, %v6314_v56  ;;  %v4509_v18 = vadd.f32 %v4508_v41, %v4507_v24  ;;  %v4572_v29 = vpop.f32.mrb[119].mxu1 }
 0x28c   : > { %v4573_v25 = vadd.f32 %v4572_v29, %v4571_v9 }
 0x28d   : > { %v2940_v17 = vadd.f32 %v4570_v28, %v2843_v21  ;;  %v2846_v20 = vadd.f32 %v4509_v18, %v6317_v40  ;;  %4648 = vmatprep.mubr.msk.bf16.mxu0 %vm3025_vm2, %v2982_v10  ;;  %4772 = vmatpush3.bf16.msra.mxu0 %v2982_v10 }
 0x28e   : > { %4773 = vmatprep.subr.bf16.mxu0 %v5382_v12 }
 0x28f   : > { %v2943_v33 = vadd.f32 %v4573_v25, %v2846_v20  ;;  %v4510_v23 = vpop.f32.mrb[120].mxu0  ;;  %v2972_v26 = vmax.f32 %v2940_v17, 0.0 }
 0x290   : > { %v4511_v39 = vpop.f32.mrb[121].mxu0  ;;  %v4574_v36 = vpop.f32.mrb[120].mxu1 }
 0x291   : > { %v2973_v27 = vmax.f32 %v2943_v33, 0.0  ;;  %v4512_v44 = vadd.f32 %v4511_v39, %v4510_v23  ;;  %v4513_v2 = vpop.f32.mrb[122].mxu0  ;;  %v4575_v56 = vpop.f32.mrb[121].mxu1 }
 0x292   : > { %v4576_v60 = vadd.f32 %v4575_v56, %v4574_v36  ;;  %v4514_v43 = vpop.f32.mrb[123].mxu0  ;;  %v4577_v30 = vpop.f32.mrb[122].mxu1 }
 0x293   : > { %v2983_v32 = vpack.c.bf16 %v2973_v27, %v2972_v26  ;;  %v2851_v40 = vadd.f32 %v4512_v44, %v6320_v11  ;;  %v4515_v51 = vadd.f32 %v4514_v43, %v4513_v2  ;;  %v4578_v46 = vpop.f32.mrb[123].mxu1 }
 0x294   : > { %v4579_v34 = vadd.f32 %v4578_v46, %v4577_v30 }
 0x295   : > { %v2948_v49 = vadd.f32 %v4576_v60, %v2851_v40  ;;  %v2854_v38 = vadd.f32 %v4515_v51, %v6323_v59  ;;  %4649 = vmatmul.mubr.msk.bf16.gmra.mrb[136].mxu0 %vm3025_vm2, %v2983_v32 }
 0x296   : > { %4775 = vmatpush3.bf16.msra.mxu0 %v2983_v32 }
 0x297   : > { %v2951_v37 = vadd.f32 %v4579_v34, %v2854_v38  ;;  %v4516_v52 = vpop.f32.mrb[124].mxu0  ;;  %4776 = vmatprep.subr.bf16.mxu0 %v5382_v12  ;;  %v2974_v57 = vmax.f32 %v2948_v49, 0.0 }
 0x298   : > { %v4517_v42 = vpop.f32.mrb[125].mxu0  ;;  %v4580_v45 = vpop.f32.mrb[124].mxu1 }
 0x299   : > { %v2975_v47 = vmax.f32 %v2951_v37, 0.0  ;;  %v4518_v48 = vadd.f32 %v4517_v42, %v4516_v52  ;;  %v4519_v62 = vpop.f32.mrb[126].mxu0  ;;  %v4581_v11 = vpop.f32.mrb[125].mxu1 }
 0x29a   : > { %v4582_v16 = vadd.f32 %v4581_v11, %v4580_v45  ;;  %v4520_v50 = vpop.f32.mrb[127].mxu0  ;;  %v4583_v54 = vpop.f32.mrb[126].mxu1 }
 0x29b   : > { %v2984_v22 = vpack.c.bf16 %v2975_v47, %v2974_v57  ;;  %v2859_v59 = vadd.f32 %v4518_v48, %v6326_v31  ;;  %v4521_v4 = vadd.f32 %v4520_v50, %v4519_v62  ;;  %v4584_v7 = vpop.f32.mrb[127].mxu1 }
 0x29c   : > { %v4585_v53 = vadd.f32 %v4584_v7, %v4583_v54 }
 0x29d   : > { %v2956_v0 = vadd.f32 %v4582_v16, %v2859_v59  ;;  %v2862_v55 = vadd.f32 %v4521_v4, %v6329_v15  ;;  %4652 = vmatprep.mubr.msk.bf16.mxu0 %vm3025_vm2, %v2984_v22  ;;  %4778 = vmatpush3.bf16.msra.mxu0 %v2984_v22 }
 0x29e   : > { %4779 = vmatprep.subr.bf16.mxu0 %v5382_v12 }
 0x29f   : > { %v2959_v5 = vadd.f32 %v4585_v53, %v2862_v55  ;;  %v2976_v58 = vmax.f32 %v2956_v0, 0.0 }
 0x2a1   : > { %v2977_v8 = vmax.f32 %v2959_v5, 0.0 }
 0x2a3   : > { %v2985_v61 = vpack.c.bf16 %v2977_v8, %v2976_v58 }
 0x2a5   : > { %4653 = vmatmul.mubr.msk.bf16.gmra.mrb[140].mxu0 %vm3025_vm2, %v2985_v61 }
 0x2a6   : > { %4781 = vmatpush3.bf16.msra.mxu0 %v2985_v61 }
 0x348   : > { %v4642_v31 = vpop.f32.mrb[128].mxu0 }
 0x349   : > { %v6365_v13 = vadd.f32 %v4642_v31, %v6362_v63  ;;  %v3084_v1 = vpop.f32.mrb[129].mxu0 }
 0x34a   : > { %v6368_v15 = vadd.f32 %v6362_v63, %v3084_v1  ;;  %v4643_v3 = vpop.f32.mrb[130].mxu0 }
 0x34b   : > { %v4034_v19 = vmul.f32 -1.442695, %v6365_v13  ;;  %v6372_v14 = vadd.f32 %v4643_v3, %v6362_v63  ;;  %v3087_v6 = vpop.f32.mrb[131].mxu0 }
 0x34c   : > { %v4032_v24 = vmul.f32 -1.442695, %v6368_v15  ;;  %v6376_v35 = vadd.f32 %v6362_v63, %v3087_v6 }
 0x34d   : > { %5021 = vpow2.f32 %v4034_v19  ;;  %v4035_v28 = vmul.f32 -1.442695, %v6372_v14 }
 0x34e   : > { %5023 = vpow2.f32 %v4032_v24  ;;  %v4033_v41 = vmul.f32 -1.442695, %v6376_v35 }
 0x34f   : > { %5025 = vpow2.f32 %v4035_v28 }
 0x350   : > { %5027 = vpow2.f32 %v4033_v41 }
 0x357   : > { %v5022_v9 = vpop.eup %5021 }
 0x358   : > { %v5024_v10 = vpop.eup %5023  ;;  %v3213_v21 = vadd.f32 1.0, %v5022_v9  ;;  %v4646_v18 = vpop.f32.mrb[132].mxu0 }
 0x359   : > { %v3211_v29 = vadd.f32 1.0, %v5024_v10  ;;  %v6381_v25 = vadd.f32 %v4646_v18, %v6362_v63  ;;  %v3100_v17 = vpop.f32.mrb[133].mxu0  ;;  %v5026_v20 = vpop.eup %5025 }
 0x35a   : > { %5029 = vrcp.f32 %v3213_v21  ;;  %v6384_v33 = vadd.f32 %v6362_v63, %v3100_v17  ;;  %v4647_v23 = vpop.f32.mrb[134].mxu0  ;;  %v3214_v39 = vadd.f32 1.0, %v5026_v20  ;;  %v5028_v44 = vpop.eup %5027 }
 0x35b   : > { %5031 = vrcp.f32 %v3211_v29  ;;  %v4038_v36 = vmul.f32 -1.442695, %v6381_v25  ;;  %v6388_v26 = vadd.f32 %v4647_v23, %v6362_v63  ;;  %v3103_v27 = vpop.f32.mrb[135].mxu0  ;;  %v3212_v2 = vadd.f32 1.0, %v5028_v44 }
 0x35c   : > { %5033 = vrcp.f32 %v3214_v39  ;;  %v4036_v56 = vmul.f32 -1.442695, %v6384_v33  ;;  %v6392_v60 = vadd.f32 %v6362_v63, %v3103_v27 }
 0x35d   : > { %5035 = vpow2.f32 %v4038_v36  ;;  %v4039_v43 = vmul.f32 -1.442695, %v6388_v26 }
 0x35e   : > { %5037 = vrcp.f32 %v3212_v2  ;;  %v4037_v30 = vmul.f32 -1.442695, %v6392_v60 }
 0x35f   : > { %5039 = vpow2.f32 %v4036_v56 }
 0x360   : > { %5041 = vpow2.f32 %v4039_v43 }
 0x361   : > { %5043 = vpow2.f32 %v4037_v30 }
 0x364   : > { %v5030_v32 = vpop.eup %5029 }
 0x365   : > { %v5032_v40 = vpop.eup %5031  ;;  %3279 = vrot.lane.b32.xlu1 %v5030_v32, %s5383_s26 }
 0x366   : > { %3275 = vrot.lane.b32.xlu0 %v5032_v40, %s5383_s26  ;;  %v5034_v51 = vpop.eup %5033 }
 0x367   : > { %v5036_v46 = vpop.eup %5035 }
 0x368   : > { %v4650_v34 = vpop.f32.mrb[136].mxu0  ;;  %v5038_v49 = vpop.eup %5037  ;;  %v3217_v57 = vadd.f32 1.0, %v5036_v46 }
 0x369   : > { %v6399_v38 = vadd.f32 %v4650_v34, %v6362_v63  ;;  %3281 = vrot.lane.b32.xlu1 %v5034_v51, %s5383_s26  ;;  %v3116_v37 = vpop.f32.mrb[137].mxu0  ;;  %v5040_v45 = vpop.eup %5039 }
 0x36a   : > { %v6403_v52 = vadd.f32 %v6362_v63, %v3116_v37  ;;  %v4651_v42 = vpop.f32.mrb[138].mxu0  ;;  %3277 = vrot.lane.b32.xlu0 %v5038_v49, %s5383_s26  ;;  %v3215_v48 = vadd.f32 1.0, %v5040_v45  ;;  %v5042_v11 = vpop.eup %5041  ;;  %v5385_v45 = vmov 0.0  }
 0x36b   : > { %v3119_v47 = vpop.f32.mrb[139].mxu0  ;;  %v4042_v62 = vmul.f32 -1.442695, %v6399_v38  ;;  %v6409_v50 = vadd.f32 %v4651_v42, %v6362_v63  ;;  %v5044_v22 = vpop.eup %5043  ;;  %v3218_v59 = vadd.f32 1.0, %v5042_v11  ;;  %4688 = vmatprep.mubr.msk.f32.mxu1 %vm5384_vm3, %v5385_v45  ;;  %4723 = vmatprep.mubr.msk.f32.mxu0 %vm5384_vm3, %v5385_v45 }
 0x36c   : > { %v4040_v16 = vmul.f32 -1.442695, %v6403_v52  ;;  %5045 = vrcp.f32 %v3215_v48  ;;  %v6412_v54 = vadd.f32 %v6362_v63, %v3119_v47  ;;  %v3216_v4 = vadd.f32 1.0, %v5044_v22 }
 0x36d   : > { %5047 = vrcp.f32 %v3217_v57  ;;  %v4043_v7 = vmul.f32 -1.442695, %v6409_v50 }
 0x36e   : > { %5049 = vpow2.f32 %v4042_v62  ;;  %v4041_v53 = vmul.f32 -1.442695, %v6412_v54 }
 0x36f   : > { %5051 = vpow2.f32 %v4040_v16 }
 0x370   : > { %5053 = vrcp.f32 %v3216_v4 }
 0x371   : > { %5055 = vrcp.f32 %v3218_v59 }
 0x372   : > { %5057 = vpow2.f32 %v4043_v7 }
 0x373   : > { %5059 = vpow2.f32 %v4041_v53 }
 0x376   : > { %v5046_v0 = vpop.eup %5045 }
 0x377   : > { %v5048_v5 = vpop.eup %5047  ;;  %3283 = vrot.lane.b32.xlu0 %v5046_v0, %s5383_s26 }
 0x378   : > { %v4654_v55 = vpop.f32.mrb[140].mxu0  ;;  %v5050_v61 = vpop.eup %5049 }
 0x379   : > { %v6418_v58 = vadd.f32 %v4654_v55, %v6362_v63  ;;  %v3132_v8 = vpop.f32.mrb[141].mxu0  ;;  %v5052_v3 = vpop.eup %5051  ;;  %v3221_v18 = vadd.f32 1.0, %v5050_v61 }
 0x37a   : > { %v6421_v31 = vadd.f32 %v6362_v63, %v3132_v8  ;;  %v4655_v1 = vpop.f32.mrb[142].mxu0  ;;  %v5054_v24 = vpop.eup %5053  ;;  %v3219_v28 = vadd.f32 1.0, %v5052_v3 }
 0x37b   : > { %v4046_v19 = vmul.f32 -1.442695, %v6418_v58  ;;  %v3135_v6 = vpop.f32.mrb[143].mxu0  ;;  %v6426_v9 = vadd.f32 %v4655_v1, %v6362_v63  ;;  %3285 = vrot.lane.b32.xlu1 %v5054_v24, %s5383_s26  ;;  %3287 = vrot.lane.b32.xlu0 %v5048_v5, %s5383_s26  ;;  %v5056_v21 = vpop.eup %5055 }
 0x37c   : > { %v4044_v41 = vmul.f32 -1.442695, %v6421_v31  ;;  %v6431_v10 = vadd.f32 %v6362_v63, %v3135_v6  ;;  %v5058_v29 = vpop.eup %5057 }
 0x37d   : > { %5061 = vpow2.f32 %v4046_v19  ;;  %v5060_v17 = vpop.eup %5059  ;;  %v4047_v20 = vmul.f32 -1.442695, %v6426_v9  ;;  %v3222_v36 = vadd.f32 1.0, %v5058_v29 }
 0x37e   : > { %5063 = vrcp.f32 %v3219_v28  ;;  %v3220_v23 = vadd.f32 1.0, %v5060_v17  ;;  %v4045_v39 = vmul.f32 -1.442695, %v6431_v10 }
 0x37f   : > { %5065 = vpow2.f32 %v4044_v41  ;;  %3289 = vrot.lane.b32.xlu1 %v5056_v21, %s5383_s26 }
 0x380   : > { %5067 = vrcp.f32 %v3221_v18 }
 0x381   : > { %5069 = vrcp.f32 %v3220_v23 }
 0x382   : > { %5071 = vpow2.f32 %v4047_v20 }
 0x383   : > { %5073 = vpow2.f32 %v4045_v39 }
 0x384   : > { %5075 = vrcp.f32 %v3222_v36 }
 0x387   : > { %v5062_v63 = vpop.eup %5061 }
 0x388   : > { %v5064_v27 = vpop.eup %5063  ;;  %v3225_v43 = vadd.f32 1.0, %v5062_v63 }
 0x389   : > { %v5066_v44 = vpop.eup %5065  ;;  %3291 = vrot.lane.b32.xlu0 %v5064_v27, %s5383_s26 }
 0x38a   : > { %v3223_v2 = vadd.f32 1.0, %v5066_v44  ;;  %v5068_v56 = vpop.eup %5067 }
 0x38b   : > { %v5070_v30 = vpop.eup %5069 }
 0x38c   : > { %5077 = vrcp.f32 %v3223_v2  ;;  %v5072_v32 = vpop.eup %5071  ;;  %3293 = vrot.lane.b32.xlu1 %v5070_v30, %s5383_s26 }
 0x38d   : > { %3295 = vrot.lane.b32.xlu0 %v5068_v56, %s5383_s26  ;;  %v5074_v40 = vpop.eup %5073  ;;  %5079 = vrcp.f32 %v3225_v43  ;;  %v3226_v34 = vadd.f32 1.0, %v5072_v32 }
 0x38e   : > { %v3224_v51 = vadd.f32 1.0, %v5074_v40  ;;  %v5076_v46 = vpop.eup %5075 }
 0x390   : > { %5081 = vrcp.f32 %v3224_v51  ;;  %3297 = vrot.lane.b32.xlu1 %v5076_v46, %s5383_s26 }
 0x391   : > { %5083 = vrcp.f32 %v3226_v34  ;;  %v3339_v34 = vld [vmem:[#allocation14] sm:$0x1] }
 0x392   : > { %5085 = vtanh.f32 %v6365_v13 }
 0x393   : > { %5087 = vtanh.f32 %v6368_v15 }
 0x394   : > { %5089 = vtanh.f32 %v6372_v14 }
 0x395   : > { %5091 = vtanh.f32 %v6376_v35 }
 0x396   : > { %v5078_v49 = vpop.eup %5077  ;;  %5093 = vtanh.f32 %v6384_v33 }
 0x397   : > { %3299 = vrot.lane.b32.xlu0 %v5078_v49, %s5383_s26  ;;  %v5080_v37 = vpop.eup %5079  ;;  %5095 = vtanh.f32 %v6392_v60  ;;  %v3465_v49 = vlaneseq }
 0x398   : > { %5097 = vtanh.f32 %v6381_v25 }
 0x399   : > { %5099 = vtanh.f32 %v6388_v26 }
 0x39a   : > { %v5082_v42 = vpop.eup %5081  ;;  %5101 = vtanh.f32 %v6403_v52 }
 0x39b   : > { %3303 = vrot.lane.b32.xlu0 %v5080_v37, %s5383_s26  ;;  %3301 = vrot.lane.b32.xlu1 %v5082_v42, %s5383_s26  ;;  %v5084_v57 = vpop.eup %5083  ;;  %5103 = vtanh.f32 %v6412_v54  ;;  %v3466_v37 = vand.u32 127, %v3465_v49  ;;  %v3467_v42 = vstv %s4065_s22 }
 0x39c   : > { %v5086_v62 = vpop.eup %5085  ;;  %5105 = vtanh.f32 %v6399_v38 }
 0x39d   : > { %v5088_v11 = vpop.eup %5087  ;;  %5107 = vtanh.f32 %v6409_v50  ;;  %v3468_v45 = vadd.s32 %v3467_v42, %v3466_v37 }
 0x39e   : > { %v5090_v16 = vpop.eup %5089  ;;  %5109 = vtanh.f32 %v6421_v31 }
 0x39f   : > { %3305 = vrot.lane.b32.xlu1 %v5084_v57, %s5383_s26  ;;  %v5092_v59 = vpop.eup %5091  ;;  %5111 = vtanh.f32 %v6431_v10  ;;  %v3341_v57 = vstv %s3340_s20  ;;  %vm3469_vm5 = vcmp.lt.s32.totalorder %v3468_v45, 300 }
 0x3a0   : > { %v5094_v35 = vpop.eup %5093  ;;  %5113 = vtanh.f32 %v6418_v58 }
 0x3a1   : > { %v5096_v8 = vpop.eup %5095  ;;  %5115 = vtanh.f32 %v6426_v9 }
 0x3a2   : > { %v5098_v6 = vpop.eup %5097 }
 0x3a3   : > { %v5100_v24 = vpop.eup %5099 }
 0x3a4   : > { %v5102_v21 = vpop.eup %5101 }
 0x3a5   : > { %v5104_v18 = vpop.eup %5103 }
 0x3a6   : > { %v5106_v23 = vpop.eup %5105 }
 0x3a7   : > { %v5108_v54 = vpop.eup %5107 }
 0x3a8   : > { %v5110_v31 = vpop.eup %5109 }
 0x3a9   : > { %v5112_v10 = vpop.eup %5111 }
 0x3aa   : > { %v5114_v30 = vpop.eup %5113 }
 0x3ab   : > { %v5116_v40 = vpop.eup %5115 }
 0x3d7   : > { %v3280_v47 = vpop.permute.xlu1 %3279 }
 0x3d8   : > { %v3276_v48 = vpop.permute.xlu0 %3275  ;;  %v3325_v4 = vmul.f32 %v5086_v62, %v3280_v47 }
 0x3d9   : > { %v3323_v0 = vmul.f32 %v5088_v11, %v3276_v48 }
 0x3db   : > { %v3282_v22 = vpop.permute.xlu1 %3281 }
 0x3dc   : > { %v3326_v7 = vmul.f32 %v5090_v16, %v3282_v22  ;;  %v3278_v53 = vpop.permute.xlu0 %3277  ;;  %v5386_v16 = vmov 0   ;;  %v3471_v22 = vld [vmem:[#allocation2] sm:$0x1] }
 0x3dd   : > { %v3324_v55 = vmul.f32 %v5092_v59, %v3278_v53  ;;  %4887 = vset.pattern.permute.xlu1 %v5386_v16  ;;  %4888 = vset.pattern.permute.xlu0 %v5386_v16 }
 0x3de   : > { %v4731_v5 = vpack.c.bf16 %v3326_v7, %v3325_v4 }
 0x3df   : > { %v4727_v15 = vpack.c.bf16 %v3324_v55, %v3323_v0  ;;  %v3486_v55 = vshrl.u32 %v3465_v49, 7 }
 0x3e1   : > { %4729 = vmatpush3.bf16.xpose.msk.msra.mxu1 %vm6450_vm4, %v4727_v15 }
 0x3e2   : > { %4730 = vmatprep.subr.bf16.mxu1 %v5382_v12 }
 0x3e9   : > { %4733 = vmatpush3.bf16.xpose.msk.msra.mxu1 %vm6450_vm4, %v4731_v5  ;;  %v3284_v14 = vpop.permute.xlu0 %3283  ;;  %v3487_v5 = vsub.s32 0, %v3486_v55 }
 0x3ea   : > { %4734 = vmatprep.subr.bf16.mxu1 %v5382_v12  ;;  %v3327_v1 = vmul.f32 %v5094_v35, %v3284_v14 }
 0x3ed   : > { %v3286_v61 = vpop.permute.xlu1 %3285  ;;  %v3288_v19 = vpop.permute.xlu0 %3287 }
 0x3ee   : > { %v3328_v3 = vmul.f32 %v5096_v8, %v3286_v61  ;;  %v3329_v28 = vmul.f32 %v5098_v6, %v3288_v19 }
 0x3f0   : > { %v4735_v33 = vpack.c.bf16 %v3328_v3, %v3327_v1  ;;  %v3492_v1 = vld [vmem:[#allocation3] sm:$0x1] }
 0x3f1   : > { %v3290_v60 = vpop.permute.xlu1 %3289 }
 0x3f2   : > { %v3330_v25 = vmul.f32 %v5100_v24, %v3290_v60  ;;  %4737 = vmatpush3.bf16.xpose.msk.msra.mxu1 %vm6450_vm4, %v4735_v33  ;;  %v3500_v60 = vld [vmem:[#allocation4] sm:$0x1] }
 0x3f3   : > { %4738 = vmatprep.subr.bf16.mxu1 %v5382_v12 }
 0x3f4   : > { %v4739_v26 = vpack.c.bf16 %v3330_v25, %v3329_v28 }
 0x3fa   : > { %4741 = vmatpush3.bf16.xpose.msk.msra.mxu1 %vm6450_vm4, %v4739_v26 }
 0x3fb   : > { %v3292_v41 = vpop.permute.xlu0 %3291  ;;  %4742 = vmatprep.subr.bf16.mxu1 %v5382_v12 }
 0x3fc   : > { %v3331_v17 = vmul.f32 %v5102_v21, %v3292_v41 }
 0x3fe   : > { %v3294_v29 = vpop.permute.xlu1 %3293 }
 0x3ff   : > { %v3332_v52 = vmul.f32 %v5104_v18, %v3294_v29  ;;  %v3296_v20 = vpop.permute.xlu0 %3295  ;;  %v5387_v18 = vmov (!%p4066_p6), 0  }
 0x400   : > { %v3333_v50 = vmul.f32 %v5106_v23, %v3296_v20 }
 0x401   : > { %v4743_v39 = vpack.c.bf16 %v3332_v52, %v3331_v17 }
 0x402   : > { %v3298_v38 = vpop.permute.xlu1 %3297 }
 0x403   : > { %v3334_v36 = vmul.f32 %v5108_v54, %v3298_v38  ;;  %4745 = vmatpush3.bf16.xpose.msk.msra.mxu1 %vm6450_vm4, %v4743_v39 }
 0x404   : > { %4746 = vmatprep.subr.bf16.mxu1 %v5382_v12 }
 0x405   : > { %v4747_v63 = vpack.c.bf16 %v3334_v36, %v3333_v50 }
 0x409   : > { %v3300_v27 = vpop.permute.xlu0 %3299 }
 0x40a   : > { %v3335_v2 = vmul.f32 %v5110_v31, %v3300_v27 }
 0x40b   : > { %4749 = vmatpush3.bf16.xpose.msk.msra.mxu1 %vm6450_vm4, %v4747_v63 }
 0x40c   : > { %4750 = vmatprep.subr.bf16.mxu1 %v5382_v12 }
 0x40d   : > { %v3302_v44 = vpop.permute.xlu1 %3301  ;;  %v3304_v43 = vpop.permute.xlu0 %3303 }
 0x40e   : > { %v3336_v56 = vmul.f32 %v5112_v10, %v3302_v44  ;;  %v3337_v58 = vmul.f32 %v5114_v30, %v3304_v43 }
 0x410   : > { %v4751_v32 = vpack.c.bf16 %v3336_v56, %v3335_v2 }
 0x411   : > { %v3306_v51 = vpop.permute.xlu1 %3305 }
 0x412   : > { %v3338_v46 = vmul.f32 %v5116_v40, %v3306_v51 }
 0x413   : > { %4753 = vmatpush3.bf16.xpose.msk.msra.mxu1 %vm6450_vm4, %v4751_v32 }
 0x414   : > { %v4755_v9 = vpack.c.bf16 %v3338_v46, %v3337_v58  ;;  %4754 = vmatprep.subr.bf16.mxu1 %v5382_v12 }
 0x41b   : > { %4757 = vmatpush3.bf16.xpose.msk.msra.mxu1 %vm6450_vm4, %v4755_v9 }
 0x422   : > { %4689 = vmatmul.mubr.msk.f32.vlgmr.msra.gmra.mrb[128].mxu1 %vm3025_vm2, %v3339_v34 }
 0x4f5   : > { %v3459_v47 = vpop.f32.mrb[128].mxu1 }
 0x4f6   : > { %v3460_v48 = vadd.f32 %v3459_v47, %v3341_v57  ;;  %v4690_v62 = vpop.f32.mrb[129].mxu1 }
 0x4f8   : > { %3463 = vst [vmem:[%s375_s14] sm:$0x1] %v3460_v48  ;;  %v3470_v12 = vsel %vm3469_vm5, %v3460_v48, -inf }
 0x4f9   : > { %v3473_v11 = vsel %vm3472_vm6, %v3470_v12, -inf }
 0x4fa   : > { %3474 = vmax.xlane.f32.xlu0 %v3473_v11 }
 0x587   : > { %v3475_v59 = vpop.xlane.xlu0 %3474 }
 0x588   : > { %v3476_v4 = vmax.f32 %v3471_v22, %v3475_v59 }
 0x58a   : > { %v3477_v7 = vsub.f32 %v3471_v22, %v3476_v4  ;;  %3584 = vst.msk [vmem:[#allocation2] sm:$0x1] %vm3498_vm7, %v3476_v4  ;;  %3482 = vperm.xlu1 %4887, %v3476_v4  }
 0x58c   : > { %v3478_v53 = vmul.f32 1.442695, %v3477_v7 }
 0x58e   : > { %5117 = vpow2.f32 %v3478_v53 }
 0x598   : > { %v5118_v0 = vpop.eup %5117 }
 0x599   : > { %3503 = vperm.xlu0 %4888, %v5118_v0   ;;  %v3493_v3 = vmul.f32 %v5118_v0, %v3492_v1 }
 0x59d   : > { %5121 = vset.pattern.permute.xlu0 (!%p4066_p6), %v5387_v18 }
 0x609   : > { %v3483_v13 = vpop.permute.xlu1 %3482 }
 0x60a   : > { %v3488_v15 = vrot.slane %v3483_v13, %v3487_v5 }
 0x60c   : > { %v3489_v14 = vsub.f32 %v3470_v12, %v3488_v15 }
 0x60e   : > { %v3490_v35 = vmul.f32 1.442695, %v3489_v14 }
 0x610   : > { %5119 = vpow2.f32 %v3490_v35 }
 0x618   : > { %v3504_v33 = vpop.permute.xlu0 %3503 }
 0x619   : > { %v3509_v24 = vrot.slane %v3504_v33, %v3487_v5 }
 0x61a   : > { %v5120_v8 = vpop.eup %5119 }
 0x61b   : > { %4724 = vmatmul.mubr.f32.vlgmr.msra.gmra.mrb[144].mxu0 %v5120_v8  ;;  %v3494_v61 = vsel %vm3472_vm6, %v5120_v8, 0.0  ;;  %v3510_v28 = vmul.f32 %v3509_v24, %v3500_v60 }
 0x61c   : > { %3495 = vadd.xlane.f32.xlu1 %v3494_v61 }
 0x6a9   : > { %v3496_v19 = vpop.xlane.xlu1 %3495 }
 0x6aa   : > { %v3497_v6 = vadd.f32 %v3496_v19, %v3493_v3 }
 0x6ac   : > { %3499 = vst.msk [vmem:[#allocation3] sm:$0x1] %vm3498_vm7, %v3497_v6 }
 0x6b3   : > { %v3590_v21 = vld [vmem:[#allocation3] sm:$0x1] (!%p4066_p6) }
 0x6b4   : > { %3593 = vperm.xlu0 (!%p4066_p6), %5121, %v3590_v21  }
 0x6eb   : > { %3588 = sbr.rel (%p4066_p6) target bundleno = 1860 (0x744), region = 76 }
 0x6ee   : > { %v3577_v25 = vpop.f32.mrb[144].mxu0 }
 0x6ef   : > { %v3581_v26 = vadd.f32 %v3577_v25, %v3510_v28  ;;  %v4725_v41 = vpop.f32.mrb[145].mxu0 }
 0x6f1   : > { %3583 = vst.msk [vmem:[#allocation4] sm:$0x1] %vm3582_vm8, %v3581_v26 }
 0x6f8   : > { %v3589_v52 = vld [vmem:[#allocation4] sm:$0x1] }
 0x733   : > { %v3594_v29 = vpop.permute.xlu0 %3593 }
 0x734   : > { %v3599_v17 = vrot.slane %v3594_v29, %v3487_v5 }
 0x736   : > { %5122 = vrcp.f32 %v3599_v17 }
 0x740   : > { %v5123_v20 = vpop.eup %5122 }
 0x741   : > { %v3601_v23 = vmul.f32 %v5123_v20, %v3589_v52 }
 0x743   : > { %3602 = vst.msk [vmem:[#allocation15] sm:$0x1] %vm3582_vm8, %v3601_v23 }
 0x744 PF: > { %s5388_s21 = smov [#allocation15]   ;;  %s4068_s28 = sshll.u32 %s5459_s6, 4 }
 0x745   : > { %s3614_s19 = sshll.u32 %s5388_s21, 4  ;;  %s6504_s15 = scalar_lea.hbm %s6573_s8, %s4068_s28  ;;  %s3615_s19 = int_to_ptr.vmem [resolvable:$true] %s3614_s19 }
 0x746   : > { %s5266_s12 = scalar_lea.vmem %s3615_s19, 16  ;;  %p6596_p3 = scmp.eq.s32.totalorder %s5459_s6, 2 }
 0x747   : > { %p5267_p9 = scmp.ne.s32.totalorder %s3615_s19, %s5266_s12  ;;  %s5272_s16 = scalar_lea.vmem %s3615_s19, 32 }
 0x748   : > { %p5273_p13 = scmp.lt.s32.totalorder %s3615_s19, %s3615_s19  ;;  %p5274_p0 = scmp.lt.s32.totalorder %s5272_s16, %s5266_s12 }
 0x749   : > { %p5268_p7 = pnand %p5267_p9, %p6596_p3 }
 0x74a   : > { %p5275_p5 = por %p5274_p0, %p5273_p13 }
 0x74b   : > { %p5269_p10 = pneg %p5268_p7 }
 0x74d   : > { %p5276_p11 = pnand %p5275_p5, %p5269_p10 }
 0x74f   : > { %5279 = shalt.err (!%p5276_p11)
}
 0x750   : > { %s5280_s26 = scalar_lea.hbm %s6572_s7, 16  ;;  %p6597_p12 = pmov %p6596_p3 }
 0x751   : > { %p5281_p8 = scmp.ne.s32.totalorder %s6572_s7, %s5280_s26  ;;  %p5286_p6 = scmp.lt.u32.totalorder %s5280_s26, %s6572_s7 }
 0x753   : > { %p5282_p2 = pnand %p5281_p8, %p6597_p12 }
 0x755   : > { %p5283_p4 = pneg %p5282_p2 }
 0x757   : > { %p5288_p9 = pnand %p5286_p6, %p5283_p4 }
 0x759   : > { %5291 = shalt.err (!%p5288_p9)
}
 0x75a   : > { %4801 = dma.vmem_to_hbm [thread:$0]  (%p6596_p3), %s3615_s19, 16, %s6572_s7, [#allocation8]  }
 0x75b   : > { %s3627_s12 = sshll.u32 %s375_s14, 4  ;;  %s3604_s16 = scalar_lea.sflag [#allocation17], %s5650_s24  ;;  %s3628_s12 = int_to_ptr.vmem [resolvable:$true] %s3627_s12 }
 0x75c   : > { %s5292_s18 = scalar_lea.vmem %s3628_s12, 16  ;;  %s5389_s17 = smov [#allocation16]  }
 0x75d   : > { %p5293_p7 = scmp.ne.s32.totalorder %s3628_s12, %s5292_s18  ;;  %s5296_s26 = sshll.u32 %s5389_s17, 4  ;;  %s5297_s26 = int_to_ptr.vmem [resolvable:$false] %s5296_s26 }
 0x75e   : > { %s5298_s20 = scalar_lea.vmem %s5297_s26, 32  ;;  %p5299_p0 = scmp.lt.s32.totalorder %s3628_s12, %s5297_s26 }
 0x75f   : > { %p5294_p10 = pnand %p5293_p7, %p5597_p1  ;;  %p5300_p5 = scmp.lt.s32.totalorder %s5298_s20, %s5292_s18 }
 0x761   : > { %p5295_p13 = pneg %p5294_p10  ;;  %p5301_p11 = por %p5300_p5, %p5299_p0 }
 0x763   : > { %p5302_p8 = pnand %p5301_p11, %p5295_p13 }
 0x765   : > { %5305 = shalt.err (!%p5302_p8)
}
 0x766   : > { %s5306_s24 = scalar_lea.hbm %s6504_s15, 16  ;;  %s5310_s22 = scalar_lea.hbm %s6573_s8, 48 }
 0x767   : > { %p5307_p12 = scmp.ne.s32.totalorder %s6504_s15, %s5306_s24  ;;  %p5311_p6 = scmp.lt.u32.totalorder %s6504_s15, %s6573_s8 }
 0x768   : > { %p5312_p9 = scmp.lt.u32.totalorder %s5310_s22, %s5306_s24  ;;  %p5314_p7 = scmp.lt.u32.totalorder %s5306_s24, %s6504_s15 }
 0x769   : > { %p5308_p2 = pnand %p5307_p12, %p5597_p1 }
 0x76a   : > { %p5313_p3 = por %p5312_p9, %p5311_p6 }
 0x76b   : > { %p5309_p4 = pneg %p5308_p2 }
 0x76c   : > { %p5315_p10 = por %p5314_p7, %p5313_p3 }
 0x76e   : > { %p5316_p13 = pnand %p5315_p10, %p5309_p4 }
 0x770   : > { %5319 = shalt.err (!%p5316_p13)
}
 0x771   : > { %4802 = dma.vmem_to_hbm [thread:$0]  (%p5597_p1), %s3628_s12, 16, %s6504_s15, %s3604_s16  }
 0x772   : > { %p6598_p0 = scmp.eq.s32.totalorder %s5459_s6, 2 }
 0x774   : > { %5349 = dma.done.wait (%p6598_p0), [#allocation8], 16   ;;  %p6599_p5 = pmov %p6598_p0 }
 0x776   : > { %5351 = vsyncadd (%p6599_p5), [#allocation8], 4294967280 }
 0x777 PF: > { %p4838_p11 = scmp.ge.s32.totalorder %s5370_s10, 2  ;;  %s3643_s27 = sand.u32 1, %s5358_s29  }
 0x778   : > { %p6600_p8 = scmp.ne.s32.totalorder %s6579_s13, 0  ;;  %s3644_s11 = scalar_lea.sflag [#allocation17], %s3643_s27 }
 0x77a   : > { %p4824_p12 = pnand %p4838_p11, %p6600_p8 }
 0x77c   : > { %5353 = dma.done.wait (!%p4824_p12), %s3644_s11, 16  }
 0x77d   : > { %5355 = vsyncadd (!%p4824_p12), %s3644_s11, 4294967280  ;;  %p26_p1 = scmp.ge.s32.totalorder %s5587_s2, 5   ;;  %s6601_s29 = smov %s5362_s30 }
 0x77e   : > { %s6602_s30 = smov %s5366_s9  ;;  %s6603_s9 = smov %s5603_s25 }
 0x77f   : > { %s6604_s10 = smov %s5587_s2  ;;  %28 = sbr.rel (!%p26_p1) target bundleno = 11 (0xb), region = 126 }
 0x786   :  { %3648 = vsyncpa [#allocation7], 1 }
 0x787   :  { %3650 = vsyncpa [#allocation7 + $0x1], 1 }
 0x788   :  { %3651 = vsyncpa [#allocation10], 1 }
 0x789   :  { %3652 = vsyncpa [#allocation13], 1 }
 0x78a   :  { %3653 = vsyncpa [#allocation8], 1 }
 0x78b   :  { %3655 = vsyncpa [#allocation8 + $0x1], 1 }
 0x78c   :  { %3656 = vsyncpa [#allocation17], 1 }
 0x78d   :  { %3658 = vsyncpa [#allocation17 + $0x1], 1 }

</bundles_post_ra>
